<compile_context>
chip_gen: v5e
topology: v5e:2x2
jax: 0.10.0
libtpu: 0.0.40
codegen_flags: <defaults>
</compile_context>

<pallas_src>
import functools

import jax
import jax.numpy as jnp
from jax.experimental import pallas as pl
from jax.experimental.pallas import tpu as pltpu

LOG2 = 0.6931471805599453
LANE = 128
SUBLANE = 8


def _round_up(x, m):
    return (x + m - 1) // m * m


def _ssp(x):
    # shifted softplus: softplus(x) - log(2), numerically stable (f32, VPU/EUP)
    return jnp.maximum(x, 0.0) + jnp.log1p(jnp.exp(-jnp.abs(x))) - LOG2


# ---------------------------------------------------------------------------
# Fused SchNet kernel: Gaussian smearing + all interaction blocks (one batch
# element per grid step).
# ---------------------------------------------------------------------------
def _schnet_fused_kernel(nnbh, coeff, n_blocks,
                         x_ref, r_ref, off_ref, g_ref,
                         w1_ref, b1_ref, w2_ref, b2_ref,
                         win_ref, wf2o_ref, bf2o_ref, wd_ref, bd_ref,
                         out_ref):
    na = x_ref.shape[0]
    x = x_ref[...]                                       # (Na, FP)  f32
    g = g_ref[...]                                       # (M, Na)   bf16 one-hot * mask * cutoff

    # Gaussian smearing computed once per batch element on the EUP; f_ij never
    # round-trips through HBM.  Padded offset columns hit zero rows of w1.
    diff = r_ref[...] - off_ref[...]                     # (M,1)-(1,GP) -> (M, GP)
    f = jnp.exp(coeff * diff * diff).astype(jnp.bfloat16)

    for i in range(n_blocks):                            # small, unrolled
        # filter-generating network: Dense(ssp) -> Dense
        h = _ssp(jnp.dot(f, w1_ref[i],
                         preferred_element_type=jnp.float32) + b1_ref[i])
        w = jnp.dot(h.astype(jnp.bfloat16), w2_ref[i],
                    preferred_element_type=jnp.float32) + b2_ref[i]      # (M, NFP)

        # in2f (no bias)
        y = jnp.dot(x.astype(jnp.bfloat16), win_ref[i],
                    preferred_element_type=jnp.float32)                  # (Na, NFP)

        # neighbor gather via precomputed one-hot (mask & hard cutoff folded in)
        y_nbh = jnp.dot(g, y.astype(jnp.bfloat16),
                        preferred_element_type=jnp.float32)              # (M, NFP)
        prod = y_nbh * w

        # aggregate over the (sublane-aligned) neighbor axis: reshape + sum
        agg = jnp.sum(prod.reshape(na, nnbh, prod.shape[-1]), axis=1)    # (Na, NFP)

        # f2out (shifted softplus) -> interaction dense -> residual
        yo = _ssp(jnp.dot(agg.astype(jnp.bfloat16), wf2o_ref[i],
                          preferred_element_type=jnp.float32) + bf2o_ref[i])
        v = jnp.dot(yo.astype(jnp.bfloat16), wd_ref[i],
                    preferred_element_type=jnp.float32) + bd_ref[i]
        x = x + v

    out_ref[...] = x


# ---------------------------------------------------------------------------
# Wrapper: padding, one-hot precompute, parameter stacking, pallas_call
# ---------------------------------------------------------------------------
def schnet_forward(inputs, emb, blocks, cutoff, n_gaussians):
    Z = inputs["Z"]
    R = inputs["R"]
    neighbors = inputs["neighbors"]
    nmask = inputs["neighbor_mask"].astype(jnp.float32)
    nb, na = Z.shape
    nnbh = neighbors.shape[-1]

    fdim = emb.shape[-1]
    nf = blocks[0]["win2f"].shape[-1]
    g = n_gaussians
    n_blocks = len(blocks)

    fp = _round_up(fdim, LANE)          # padded n_atom_basis
    nfp = _round_up(nf, LANE)           # padded n_filters
    gp = _round_up(g, LANE)             # padded n_gaussians
    nnbh_p = _round_up(nnbh, SUBLANE)   # padded neighbor count (sublane-aligned)
    m = na * nnbh_p

    # embedding lookup (plain-JAX table gather) + lane padding (zeros)
    x = emb[Z]                                                    # (Nb, Na, F)
    x = jnp.pad(x, ((0, 0), (0, 0), (0, fp - fdim)))

    # interatomic distances (plain-JAX neighbor-position gather)
    # TODO(synk): periodic cell / cell_offset displacement not applied (cell=None path).
    pos_j = jax.vmap(lambda p, nidx: p[nidx])(R, neighbors)       # (Nb, Na, Nnbh, 3)
    dvec = pos_j - R[:, :, None, :]
    r_ij = jnp.sqrt(jnp.sum(dvec * dvec, axis=-1))                # (Nb, Na, Nnbh)
    r_ij = jnp.where(nmask != 0, r_ij, 0.0)

    # pad neighbor axis to a multiple of 8 (padded rows fully masked out)
    pad_n = nnbh_p - nnbh
    r_p = jnp.pad(r_ij, ((0, 0), (0, 0), (0, pad_n)))
    m_p = jnp.pad(nmask, ((0, 0), (0, 0), (0, pad_n)))
    nbr_p = jnp.pad(neighbors, ((0, 0), (0, 0), (0, pad_n)))

    # one-hot gather matrix with (neighbor_mask * HardCutoff) folded in -> bf16
    wmask = m_p * (r_p <= cutoff).astype(jnp.float32)
    onehot = (nbr_p[..., None] ==
              jnp.arange(na, dtype=nbr_p.dtype)[None, None, None, :]).astype(jnp.float32)
    gather = (onehot * wmask[..., None]).reshape(nb, m, na).astype(jnp.bfloat16)

    r_flat = r_p.reshape(nb, m, 1).astype(jnp.float32)

    # Gaussian smearing constants (lane-padded; padded w1 rows are zero so the
    # extra gaussian columns never contribute)
    offsets = jnp.linspace(0.0, cutoff, g, dtype=jnp.float32)
    offsets = jnp.pad(offsets, (0, gp - g), constant_values=cutoff).reshape(1, gp)
    coeff = float(-0.5 / (cutoff / (g - 1)) ** 2)

    # stack / zero-pad / bf16-cast per-block parameters (biases stay f32)
    def pad2(a, rows, cols):
        return jnp.pad(a, ((0, rows - a.shape[0]), (0, cols - a.shape[1])))

    w1s = jnp.stack([pad2(p["w1"], gp, nfp) for p in blocks]).astype(jnp.bfloat16)
    b1s = jnp.stack([pad2(p["b1"], 1, nfp) for p in blocks])
    w2s = jnp.stack([pad2(p["w2"], nfp, nfp) for p in blocks]).astype(jnp.bfloat16)
    b2s = jnp.stack([pad2(p["b2"], 1, nfp) for p in blocks])
    wins = jnp.stack([pad2(p["win2f"], fp, nfp) for p in blocks]).astype(jnp.bfloat16)
    wf2os = jnp.stack([pad2(p["wf2out"], nfp, fp) for p in blocks]).astype(jnp.bfloat16)
    bf2os = jnp.stack([pad2(p["bf2out"], 1, fp) for p in blocks])
    wds = jnp.stack([pad2(p["wdense"], fp, fp) for p in blocks]).astype(jnp.bfloat16)
    bds = jnp.stack([pad2(p["bdense"], 1, fp) for p in blocks])

    def const(a):
        ndim = a.ndim
        return pl.BlockSpec(a.shape, lambda b, _n=ndim: (0,) * _n)

    kernel = functools.partial(_schnet_fused_kernel, nnbh_p, coeff, n_blocks)

    out = pl.pallas_call(
        kernel,
        out_shape=jax.ShapeDtypeStruct((nb, na, fp), jnp.float32),
        grid=(nb,),
        in_specs=[
            pl.BlockSpec((None, na, fp), lambda b: (b, 0, 0)),    # x (embeddings)
            pl.BlockSpec((None, m, 1), lambda b: (b, 0, 0)),      # r_ij
            const(offsets),                                       # gaussian offsets
            pl.BlockSpec((None, m, na), lambda b: (b, 0, 0)),     # one-hot gather
            const(w1s), const(b1s), const(w2s), const(b2s),
            const(wins), const(wf2os), const(bf2os), const(wds), const(bds),
        ],
        out_specs=pl.BlockSpec((None, na, fp), lambda b: (b, 0, 0)),
        compiler_params=pltpu.CompilerParams(
            dimension_semantics=("parallel",)),
    )(x, r_flat, offsets, gather,
      w1s, b1s, w2s, b2s, wins, wf2os, bf2os, wds, bds)

    return out[:, :, :fdim]


# ---------------------------------------------------------------------------
# Parameter init (deterministic, synthetic; matches nn module shapes)
# ---------------------------------------------------------------------------
def _init_dense(key, n_in, n_out, bias=True):
    kw, kb = jax.random.split(key)
    bound = (6.0 / (n_in + n_out)) ** 0.5          # xavier-uniform-like
    w = jax.random.uniform(kw, (n_in, n_out), jnp.float32, -bound, bound)
    if not bias:
        return w, None
    bb = 1.0 / (n_in ** 0.5)
    b = jax.random.uniform(kb, (1, n_out), jnp.float32, -bb, bb)
    return w, b


def init_schnet_params(key, n_atom_basis, n_filters, n_gaussians,
                       n_interactions, max_z):
    keys = jax.random.split(key, n_interactions + 1)
    emb = jax.random.normal(keys[0], (max_z, n_atom_basis), jnp.float32)
    emb = emb.at[0].set(0.0)                        # padding_idx=0
    blocks = []
    for i in range(n_interactions):
        ks = jax.random.split(keys[i + 1], 5)
        w1, b1 = _init_dense(ks[0], n_gaussians, n_filters)
        w2, b2 = _init_dense(ks[1], n_filters, n_filters)
        win2f, _ = _init_dense(ks[2], n_atom_basis, n_filters, bias=False)
        wf2out, bf2out = _init_dense(ks[3], n_filters, n_atom_basis)
        wdense, bdense = _init_dense(ks[4], n_atom_basis, n_atom_basis)
        blocks.append(dict(w1=w1, b1=b1, w2=w2, b2=b2, win2f=win2f,
                           wf2out=wf2out, bf2out=bf2out,
                           wdense=wdense, bdense=bdense))
    return emb, blocks


# ---------------------------------------------------------------------------
if __name__ == "__main__":
    # small synthetic problem: 2 molecules, 8 atoms, 7 neighbors each
    NB, NA, NNBH = 2, 8, 7
    N_ATOM_BASIS, N_FILTERS, N_GAUSSIANS, N_INTERACTIONS = 32, 32, 25, 3
    CUTOFF, MAX_Z = 5.0, 100

    key = jax.random.PRNGKey(0)
    kz, kr, kp = jax.random.split(key, 3)

    Z = jax.random.randint(kz, (NB, NA), 1, MAX_Z, dtype=jnp.int32)
    R = jax.random.normal(kr, (NB, NA, 3), jnp.float32) * 2.0

    # neighbors: each atom's neighbors are all other atoms (standard schnetpack env)
    idx = jnp.arange(NA)
    nbh = jnp.stack([jnp.concatenate([idx[:a], idx[a + 1:]]) for a in range(NA)])
    neighbors = jnp.broadcast_to(nbh[None], (NB, NA, NNBH)).astype(jnp.int32)
    neighbor_mask = jnp.ones((NB, NA, NNBH), jnp.float32)
    # knock out a couple of padded neighbors in the second molecule
    neighbor_mask = neighbor_mask.at[1, :, -2:].set(0.0)

    emb, blocks = init_schnet_params(kp, N_ATOM_BASIS, N_FILTERS,
                                     N_GAUSSIANS, N_INTERACTIONS, MAX_Z)

    inputs = dict(Z=Z, R=R, neighbors=neighbors, neighbor_mask=neighbor_mask,
                  cell=jnp.zeros((NB, 3, 3), jnp.float32),
                  cell_offset=jnp.zeros((NB, NA, NNBH, 3), jnp.float32),
                  atom_mask=jnp.ones((NB, NA), jnp.float32))

    out = schnet_forward(inputs, emb, blocks, CUTOFF, N_GAUSSIANS)
    out = jax.block_until_ready(out)

    assert out.shape == (NB, NA, N_ATOM_BASIS)
    assert bool(jnp.all(jnp.isfinite(out)))
    print("KERNEL_OK")
</pallas_src>

<mosaic_0001>
module attributes {stable_mosaic.version = 11 : i64} {
  func.func @_schnet_fused_kernel(%arg0: i32, %arg1: memref<1x8x128xf32, #tpu.memory_space<vmem>>, %arg2: memref<1x64x1xf32, #tpu.memory_space<vmem>>, %arg3: memref<1x128xf32, #tpu.memory_space<vmem>>, %arg4: memref<1x64x8xbf16, #tpu.memory_space<vmem>>, %arg5: memref<3x128x128xbf16, #tpu.memory_space<vmem>>, %arg6: memref<3x1x128xf32, #tpu.memory_space<vmem>>, %arg7: memref<3x128x128xbf16, #tpu.memory_space<vmem>>, %arg8: memref<3x1x128xf32, #tpu.memory_space<vmem>>, %arg9: memref<3x128x128xbf16, #tpu.memory_space<vmem>>, %arg10: memref<3x128x128xbf16, #tpu.memory_space<vmem>>, %arg11: memref<3x1x128xf32, #tpu.memory_space<vmem>>, %arg12: memref<3x128x128xbf16, #tpu.memory_space<vmem>>, %arg13: memref<3x1x128xf32, #tpu.memory_space<vmem>>, %arg14: memref<1x8x128xf32, #tpu.memory_space<vmem>>) attributes {dimension_semantics = [#tpu.dimension_semantics<parallel>], iteration_bounds = array<i64: 2>, scalar_prefetch = 0 : i64, scratch_operands = 0 : i64, tpu.core_type = #tpu.core_type<tc>, window_params = [{transform_indices = @transform_0, window_bounds = array<i64: 1, 8, 128>}, {transform_indices = @transform_1, window_bounds = array<i64: 1, 64, 1>}, {pipeline_mode = #tpu.pipeline_mode<synchronous>, transform_indices = @transform_2, window_bounds = array<i64: 1, 128>}, {transform_indices = @transform_3, window_bounds = array<i64: 1, 64, 8>}, {pipeline_mode = #tpu.pipeline_mode<synchronous>, transform_indices = @transform_4, window_bounds = array<i64: 3, 128, 128>}, {pipeline_mode = #tpu.pipeline_mode<synchronous>, transform_indices = @transform_5, window_bounds = array<i64: 3, 1, 128>}, {pipeline_mode = #tpu.pipeline_mode<synchronous>, transform_indices = @transform_6, window_bounds = array<i64: 3, 128, 128>}, {pipeline_mode = #tpu.pipeline_mode<synchronous>, transform_indices = @transform_7, window_bounds = array<i64: 3, 1, 128>}, {pipeline_mode = #tpu.pipeline_mode<synchronous>, transform_indices = @transform_8, window_bounds = array<i64: 3, 128, 128>}, {pipeline_mode = #tpu.pipeline_mode<synchronous>, transform_indices = @transform_9, window_bounds = array<i64: 3, 128, 128>}, {pipeline_mode = #tpu.pipeline_mode<synchronous>, transform_indices = @transform_10, window_bounds = array<i64: 3, 1, 128>}, {pipeline_mode = #tpu.pipeline_mode<synchronous>, transform_indices = @transform_11, window_bounds = array<i64: 3, 128, 128>}, {pipeline_mode = #tpu.pipeline_mode<synchronous>, transform_indices = @transform_12, window_bounds = array<i64: 3, 1, 128>}, {transform_indices = @transform_13, window_bounds = array<i64: 1, 8, 128>}]} {
    %c0 = arith.constant 0 : index
    %c0_0 = arith.constant 0 : index
    %c0_1 = arith.constant 0 : index
    %0 = vector.load %arg1[%c0, %c0_0, %c0_1] : memref<1x8x128xf32, #tpu.memory_space<vmem>>, vector<1x8x128xf32>
    %1 = vector.shape_cast %0 : vector<1x8x128xf32> to vector<8x128xf32>
    %c0_2 = arith.constant 0 : index
    %c0_3 = arith.constant 0 : index
    %c0_4 = arith.constant 0 : index
    %2 = vector.load %arg4[%c0_2, %c0_3, %c0_4] : memref<1x64x8xbf16, #tpu.memory_space<vmem>>, vector<1x64x8xbf16>
    %3 = vector.shape_cast %2 : vector<1x64x8xbf16> to vector<64x8xbf16>
    %c0_5 = arith.constant 0 : index
    %c0_6 = arith.constant 0 : index
    %c0_7 = arith.constant 0 : index
    %4 = vector.load %arg2[%c0_5, %c0_6, %c0_7] : memref<1x64x1xf32, #tpu.memory_space<vmem>>, vector<1x64x1xf32>
    %5 = vector.shape_cast %4 : vector<1x64x1xf32> to vector<64x1xf32>
    %c0_8 = arith.constant 0 : index
    %c0_9 = arith.constant 0 : index
    %6 = vector.load %arg3[%c0_8, %c0_9] : memref<1x128xf32, #tpu.memory_space<vmem>>, vector<1x128xf32>
    %7 = vector.broadcast %5 : vector<64x1xf32> to vector<64x128xf32>
    %8 = vector.broadcast %6 : vector<1x128xf32> to vector<64x128xf32>
    %9 = arith.subf %7, %8 : vector<64x128xf32>
    %cst = arith.constant -1.152000e+01 : f32
    %10 = vector.broadcast %cst : f32 to vector<64x128xf32>
    %11 = arith.mulf %10, %9 : vector<64x128xf32>
    %12 = arith.mulf %11, %9 : vector<64x128xf32>
    %13 = math.exp %12 : vector<64x128xf32>
    %14 = arith.truncf %13 : vector<64x128xf32> to vector<64x128xbf16>
    %c0_10 = arith.constant 0 : index
    %c0_11 = arith.constant 0 : index
    %c0_12 = arith.constant 0 : index
    %15 = vector.load %arg5[%c0_10, %c0_11, %c0_12] : memref<3x128x128xbf16, #tpu.memory_space<vmem>>, vector<1x128x128xbf16>
    %16 = vector.shape_cast %15 : vector<1x128x128xbf16> to vector<128x128xbf16>
    %cst_13 = arith.constant dense<0.000000e+00> : vector<64x128xf32>
    %17 = tpu.matmul %14, %16, %cst_13 {dimension_numbers = #tpu.dot_dimension_numbers<[1], [0], [0], [1], [0, 0, 1, 1], [], []>} : vector<64x128xbf16>, vector<128x128xbf16>, vector<64x128xf32> -> vector<64x128xf32>
    %c0_14 = arith.constant 0 : index
    %c0_15 = arith.constant 0 : index
    %c0_16 = arith.constant 0 : index
    %18 = vector.load %arg6[%c0_14, %c0_15, %c0_16] : memref<3x1x128xf32, #tpu.memory_space<vmem>>, vector<1x1x128xf32>
    %19 = vector.shape_cast %18 : vector<1x1x128xf32> to vector<1x128xf32>
    %20 = vector.broadcast %19 : vector<1x128xf32> to vector<64x128xf32>
    %21 = arith.addf %17, %20 : vector<64x128xf32>
    %cst_17 = arith.constant 0.000000e+00 : f32
    %22 = vector.broadcast %cst_17 : f32 to vector<64x128xf32>
    %23 = arith.maximumf %21, %22 : vector<64x128xf32>
    %24 = math.absf %21 : vector<64x128xf32>
    %cst_18 = arith.constant 0.000000e+00 : f32
    %25 = vector.broadcast %cst_18 : f32 to vector<64x128xf32>
    %26 = arith.subf %25, %24 : vector<64x128xf32>
    %27 = math.exp %26 : vector<64x128xf32>
    %28 = math.log1p %27 : vector<64x128xf32>
    %29 = arith.addf %23, %28 : vector<64x128xf32>
    %cst_19 = arith.constant 0.693147182 : f32
    %30 = vector.broadcast %cst_19 : f32 to vector<64x128xf32>
    %31 = arith.subf %29, %30 : vector<64x128xf32>
    %32 = arith.truncf %31 : vector<64x128xf32> to vector<64x128xbf16>
    %c0_20 = arith.constant 0 : index
    %c0_21 = arith.constant 0 : index
    %c0_22 = arith.constant 0 : index
    %33 = vector.load %arg7[%c0_20, %c0_21, %c0_22] : memref<3x128x128xbf16, #tpu.memory_space<vmem>>, vector<1x128x128xbf16>
    %34 = vector.shape_cast %33 : vector<1x128x128xbf16> to vector<128x128xbf16>
    %cst_23 = arith.constant dense<0.000000e+00> : vector<64x128xf32>
    %35 = tpu.matmul %32, %34, %cst_23 {dimension_numbers = #tpu.dot_dimension_numbers<[1], [0], [0], [1], [0, 0, 1, 1], [], []>} : vector<64x128xbf16>, vector<128x128xbf16>, vector<64x128xf32> -> vector<64x128xf32>
    %c0_24 = arith.constant 0 : index
    %c0_25 = arith.constant 0 : index
    %c0_26 = arith.constant 0 : index
    %36 = vector.load %arg8[%c0_24, %c0_25, %c0_26] : memref<3x1x128xf32, #tpu.memory_space<vmem>>, vector<1x1x128xf32>
    %37 = vector.shape_cast %36 : vector<1x1x128xf32> to vector<1x128xf32>
    %38 = vector.broadcast %37 : vector<1x128xf32> to vector<64x128xf32>
    %39 = arith.addf %35, %38 : vector<64x128xf32>
    %40 = arith.truncf %1 : vector<8x128xf32> to vector<8x128xbf16>
    %c0_27 = arith.constant 0 : index
    %c0_28 = arith.constant 0 : index
    %c0_29 = arith.constant 0 : index
    %41 = vector.load %arg9[%c0_27, %c0_28, %c0_29] : memref<3x128x128xbf16, #tpu.memory_space<vmem>>, vector<1x128x128xbf16>
    %42 = vector.shape_cast %41 : vector<1x128x128xbf16> to vector<128x128xbf16>
    %cst_30 = arith.constant dense<0.000000e+00> : vector<8x128xf32>
    %43 = tpu.matmul %40, %42, %cst_30 {dimension_numbers = #tpu.dot_dimension_numbers<[1], [0], [0], [1], [0, 0, 1, 1], [], []>} : vector<8x128xbf16>, vector<128x128xbf16>, vector<8x128xf32> -> vector<8x128xf32>
    %44 = arith.truncf %43 : vector<8x128xf32> to vector<8x128xbf16>
    %cst_31 = arith.constant dense<0.000000e+00> : vector<64x128xf32>
    %45 = tpu.matmul %3, %44, %cst_31 {dimension_numbers = #tpu.dot_dimension_numbers<[1], [0], [0], [1], [0, 0, 1, 1], [], []>} : vector<64x8xbf16>, vector<8x128xbf16>, vector<64x128xf32> -> vector<64x128xf32>
    %46 = arith.mulf %45, %39 : vector<64x128xf32>
    %47 = vector.shape_cast %46 : vector<64x128xf32> to vector<8x8x128xf32>
    %cst_32 = arith.constant dense<0.000000e+00> : vector<8x128xf32>
    %48 = vector.multi_reduction <add>, %47, %cst_32 [1] : vector<8x8x128xf32> to vector<8x128xf32>
    %49 = arith.truncf %48 : vector<8x128xf32> to vector<8x128xbf16>
    %c0_33 = arith.constant 0 : index
    %c0_34 = arith.constant 0 : index
    %c0_35 = arith.constant 0 : index
    %50 = vector.load %arg10[%c0_33, %c0_34, %c0_35] : memref<3x128x128xbf16, #tpu.memory_space<vmem>>, vector<1x128x128xbf16>
    %51 = vector.shape_cast %50 : vector<1x128x128xbf16> to vector<128x128xbf16>
    %cst_36 = arith.constant dense<0.000000e+00> : vector<8x128xf32>
    %52 = tpu.matmul %49, %51, %cst_36 {dimension_numbers = #tpu.dot_dimension_numbers<[1], [0], [0], [1], [0, 0, 1, 1], [], []>} : vector<8x128xbf16>, vector<128x128xbf16>, vector<8x128xf32> -> vector<8x128xf32>
    %c0_37 = arith.constant 0 : index
    %c0_38 = arith.constant 0 : index
    %c0_39 = arith.constant 0 : index
    %53 = vector.load %arg11[%c0_37, %c0_38, %c0_39] : memref<3x1x128xf32, #tpu.memory_space<vmem>>, vector<1x1x128xf32>
    %54 = vector.shape_cast %53 : vector<1x1x128xf32> to vector<1x128xf32>
    %55 = vector.broadcast %54 : vector<1x128xf32> to vector<8x128xf32>
    %56 = arith.addf %52, %55 : vector<8x128xf32>
    %cst_40 = arith.constant 0.000000e+00 : f32
    %57 = vector.broadcast %cst_40 : f32 to vector<8x128xf32>
    %58 = arith.maximumf %56, %57 : vector<8x128xf32>
    %59 = math.absf %56 : vector<8x128xf32>
    %cst_41 = arith.constant 0.000000e+00 : f32
    %60 = vector.broadcast %cst_41 : f32 to vector<8x128xf32>
    %61 = arith.subf %60, %59 : vector<8x128xf32>
    %62 = math.exp %61 : vector<8x128xf32>
    %63 = math.log1p %62 : vector<8x128xf32>
    %64 = arith.addf %58, %63 : vector<8x128xf32>
    %cst_42 = arith.constant 0.693147182 : f32
    %65 = vector.broadcast %cst_42 : f32 to vector<8x128xf32>
    %66 = arith.subf %64, %65 : vector<8x128xf32>
    %67 = arith.truncf %66 : vector<8x128xf32> to vector<8x128xbf16>
    %c0_43 = arith.constant 0 : index
    %c0_44 = arith.constant 0 : index
    %c0_45 = arith.constant 0 : index
    %68 = vector.load %arg12[%c0_43, %c0_44, %c0_45] : memref<3x128x128xbf16, #tpu.memory_space<vmem>>, vector<1x128x128xbf16>
    %69 = vector.shape_cast %68 : vector<1x128x128xbf16> to vector<128x128xbf16>
    %cst_46 = arith.constant dense<0.000000e+00> : vector<8x128xf32>
    %70 = tpu.matmul %67, %69, %cst_46 {dimension_numbers = #tpu.dot_dimension_numbers<[1], [0], [0], [1], [0, 0, 1, 1], [], []>} : vector<8x128xbf16>, vector<128x128xbf16>, vector<8x128xf32> -> vector<8x128xf32>
    %c0_47 = arith.constant 0 : index
    %c0_48 = arith.constant 0 : index
    %c0_49 = arith.constant 0 : index
    %71 = vector.load %arg13[%c0_47, %c0_48, %c0_49] : memref<3x1x128xf32, #tpu.memory_space<vmem>>, vector<1x1x128xf32>
    %72 = vector.shape_cast %71 : vector<1x1x128xf32> to vector<1x128xf32>
    %73 = vector.broadcast %72 : vector<1x128xf32> to vector<8x128xf32>
    %74 = arith.addf %70, %73 : vector<8x128xf32>
    %75 = arith.addf %1, %74 : vector<8x128xf32>
    %c1 = arith.constant 1 : index
    %c0_50 = arith.constant 0 : index
    %c0_51 = arith.constant 0 : index
    %76 = vector.load %arg5[%c1, %c0_50, %c0_51] : memref<3x128x128xbf16, #tpu.memory_space<vmem>>, vector<1x128x128xbf16>
    %77 = vector.shape_cast %76 : vector<1x128x128xbf16> to vector<128x128xbf16>
    %cst_52 = arith.constant dense<0.000000e+00> : vector<64x128xf32>
    %78 = tpu.matmul %14, %77, %cst_52 {dimension_numbers = #tpu.dot_dimension_numbers<[1], [0], [0], [1], [0, 0, 1, 1], [], []>} : vector<64x128xbf16>, vector<128x128xbf16>, vector<64x128xf32> -> vector<64x128xf32>
    %c1_53 = arith.constant 1 : index
    %c0_54 = arith.constant 0 : index
    %c0_55 = arith.constant 0 : index
    %79 = vector.load %arg6[%c1_53, %c0_54, %c0_55] : memref<3x1x128xf32, #tpu.memory_space<vmem>>, vector<1x1x128xf32>
    %80 = vector.shape_cast %79 : vector<1x1x128xf32> to vector<1x128xf32>
    %81 = vector.broadcast %80 : vector<1x128xf32> to vector<64x128xf32>
    %82 = arith.addf %78, %81 : vector<64x128xf32>
    %cst_56 = arith.constant 0.000000e+00 : f32
    %83 = vector.broadcast %cst_56 : f32 to vector<64x128xf32>
    %84 = arith.maximumf %82, %83 : vector<64x128xf32>
    %85 = math.absf %82 : vector<64x128xf32>
    %cst_57 = arith.constant 0.000000e+00 : f32
    %86 = vector.broadcast %cst_57 : f32 to vector<64x128xf32>
    %87 = arith.subf %86, %85 : vector<64x128xf32>
    %88 = math.exp %87 : vector<64x128xf32>
    %89 = math.log1p %88 : vector<64x128xf32>
    %90 = arith.addf %84, %89 : vector<64x128xf32>
    %cst_58 = arith.constant 0.693147182 : f32
    %91 = vector.broadcast %cst_58 : f32 to vector<64x128xf32>
    %92 = arith.subf %90, %91 : vector<64x128xf32>
    %93 = arith.truncf %92 : vector<64x128xf32> to vector<64x128xbf16>
    %c1_59 = arith.constant 1 : index
    %c0_60 = arith.constant 0 : index
    %c0_61 = arith.constant 0 : index
    %94 = vector.load %arg7[%c1_59, %c0_60, %c0_61] : memref<3x128x128xbf16, #tpu.memory_space<vmem>>, vector<1x128x128xbf16>
    %95 = vector.shape_cast %94 : vector<1x128x128xbf16> to vector<128x128xbf16>
    %cst_62 = arith.constant dense<0.000000e+00> : vector<64x128xf32>
    %96 = tpu.matmul %93, %95, %cst_62 {dimension_numbers = #tpu.dot_dimension_numbers<[1], [0], [0], [1], [0, 0, 1, 1], [], []>} : vector<64x128xbf16>, vector<128x128xbf16>, vector<64x128xf32> -> vector<64x128xf32>
    %c1_63 = arith.constant 1 : index
    %c0_64 = arith.constant 0 : index
    %c0_65 = arith.constant 0 : index
    %97 = vector.load %arg8[%c1_63, %c0_64, %c0_65] : memref<3x1x128xf32, #tpu.memory_space<vmem>>, vector<1x1x128xf32>
    %98 = vector.shape_cast %97 : vector<1x1x128xf32> to vector<1x128xf32>
    %99 = vector.broadcast %98 : vector<1x128xf32> to vector<64x128xf32>
    %100 = arith.addf %96, %99 : vector<64x128xf32>
    %101 = arith.truncf %75 : vector<8x128xf32> to vector<8x128xbf16>
    %c1_66 = arith.constant 1 : index
    %c0_67 = arith.constant 0 : index
    %c0_68 = arith.constant 0 : index
    %102 = vector.load %arg9[%c1_66, %c0_67, %c0_68] : memref<3x128x128xbf16, #tpu.memory_space<vmem>>, vector<1x128x128xbf16>
    %103 = vector.shape_cast %102 : vector<1x128x128xbf16> to vector<128x128xbf16>
    %cst_69 = arith.constant dense<0.000000e+00> : vector<8x128xf32>
    %104 = tpu.matmul %101, %103, %cst_69 {dimension_numbers = #tpu.dot_dimension_numbers<[1], [0], [0], [1], [0, 0, 1, 1], [], []>} : vector<8x128xbf16>, vector<128x128xbf16>, vector<8x128xf32> -> vector<8x128xf32>
    %105 = arith.truncf %104 : vector<8x128xf32> to vector<8x128xbf16>
    %cst_70 = arith.constant dense<0.000000e+00> : vector<64x128xf32>
    %106 = tpu.matmul %3, %105, %cst_70 {dimension_numbers = #tpu.dot_dimension_numbers<[1], [0], [0], [1], [0, 0, 1, 1], [], []>} : vector<64x8xbf16>, vector<8x128xbf16>, vector<64x128xf32> -> vector<64x128xf32>
    %107 = arith.mulf %106, %100 : vector<64x128xf32>
    %108 = vector.shape_cast %107 : vector<64x128xf32> to vector<8x8x128xf32>
    %cst_71 = arith.constant dense<0.000000e+00> : vector<8x128xf32>
    %109 = vector.multi_reduction <add>, %108, %cst_71 [1] : vector<8x8x128xf32> to vector<8x128xf32>
    %110 = arith.truncf %109 : vector<8x128xf32> to vector<8x128xbf16>
    %c1_72 = arith.constant 1 : index
    %c0_73 = arith.constant 0 : index
    %c0_74 = arith.constant 0 : index
    %111 = vector.load %arg10[%c1_72, %c0_73, %c0_74] : memref<3x128x128xbf16, #tpu.memory_space<vmem>>, vector<1x128x128xbf16>
    %112 = vector.shape_cast %111 : vector<1x128x128xbf16> to vector<128x128xbf16>
    %cst_75 = arith.constant dense<0.000000e+00> : vector<8x128xf32>
    %113 = tpu.matmul %110, %112, %cst_75 {dimension_numbers = #tpu.dot_dimension_numbers<[1], [0], [0], [1], [0, 0, 1, 1], [], []>} : vector<8x128xbf16>, vector<128x128xbf16>, vector<8x128xf32> -> vector<8x128xf32>
    %c1_76 = arith.constant 1 : index
    %c0_77 = arith.constant 0 : index
    %c0_78 = arith.constant 0 : index
    %114 = vector.load %arg11[%c1_76, %c0_77, %c0_78] : memref<3x1x128xf32, #tpu.memory_space<vmem>>, vector<1x1x128xf32>
    %115 = vector.shape_cast %114 : vector<1x1x128xf32> to vector<1x128xf32>
    %116 = vector.broadcast %115 : vector<1x128xf32> to vector<8x128xf32>
    %117 = arith.addf %113, %116 : vector<8x128xf32>
    %cst_79 = arith.constant 0.000000e+00 : f32
    %118 = vector.broadcast %cst_79 : f32 to vector<8x128xf32>
    %119 = arith.maximumf %117, %118 : vector<8x128xf32>
    %120 = math.absf %117 : vector<8x128xf32>
    %cst_80 = arith.constant 0.000000e+00 : f32
    %121 = vector.broadcast %cst_80 : f32 to vector<8x128xf32>
    %122 = arith.subf %121, %120 : vector<8x128xf32>
    %123 = math.exp %122 : vector<8x128xf32>
    %124 = math.log1p %123 : vector<8x128xf32>
    %125 = arith.addf %119, %124 : vector<8x128xf32>
    %cst_81 = arith.constant 0.693147182 : f32
    %126 = vector.broadcast %cst_81 : f32 to vector<8x128xf32>
    %127 = arith.subf %125, %126 : vector<8x128xf32>
    %128 = arith.truncf %127 : vector<8x128xf32> to vector<8x128xbf16>
    %c1_82 = arith.constant 1 : index
    %c0_83 = arith.constant 0 : index
    %c0_84 = arith.constant 0 : index
    %129 = vector.load %arg12[%c1_82, %c0_83, %c0_84] : memref<3x128x128xbf16, #tpu.memory_space<vmem>>, vector<1x128x128xbf16>
    %130 = vector.shape_cast %129 : vector<1x128x128xbf16> to vector<128x128xbf16>
    %cst_85 = arith.constant dense<0.000000e+00> : vector<8x128xf32>
    %131 = tpu.matmul %128, %130, %cst_85 {dimension_numbers = #tpu.dot_dimension_numbers<[1], [0], [0], [1], [0, 0, 1, 1], [], []>} : vector<8x128xbf16>, vector<128x128xbf16>, vector<8x128xf32> -> vector<8x128xf32>
    %c1_86 = arith.constant 1 : index
    %c0_87 = arith.constant 0 : index
    %c0_88 = arith.constant 0 : index
    %132 = vector.load %arg13[%c1_86, %c0_87, %c0_88] : memref<3x1x128xf32, #tpu.memory_space<vmem>>, vector<1x1x128xf32>
    %133 = vector.shape_cast %132 : vector<1x1x128xf32> to vector<1x128xf32>
    %134 = vector.broadcast %133 : vector<1x128xf32> to vector<8x128xf32>
    %135 = arith.addf %131, %134 : vector<8x128xf32>
    %136 = arith.addf %75, %135 : vector<8x128xf32>
    %c2 = arith.constant 2 : index
    %c0_89 = arith.constant 0 : index
    %c0_90 = arith.constant 0 : index
    %137 = vector.load %arg5[%c2, %c0_89, %c0_90] : memref<3x128x128xbf16, #tpu.memory_space<vmem>>, vector<1x128x128xbf16>
    %138 = vector.shape_cast %137 : vector<1x128x128xbf16> to vector<128x128xbf16>
    %cst_91 = arith.constant dense<0.000000e+00> : vector<64x128xf32>
    %139 = tpu.matmul %14, %138, %cst_91 {dimension_numbers = #tpu.dot_dimension_numbers<[1], [0], [0], [1], [0, 0, 1, 1], [], []>} : vector<64x128xbf16>, vector<128x128xbf16>, vector<64x128xf32> -> vector<64x128xf32>
    %c2_92 = arith.constant 2 : index
    %c0_93 = arith.constant 0 : index
    %c0_94 = arith.constant 0 : index
    %140 = vector.load %arg6[%c2_92, %c0_93, %c0_94] : memref<3x1x128xf32, #tpu.memory_space<vmem>>, vector<1x1x128xf32>
    %141 = vector.shape_cast %140 : vector<1x1x128xf32> to vector<1x128xf32>
    %142 = vector.broadcast %141 : vector<1x128xf32> to vector<64x128xf32>
    %143 = arith.addf %139, %142 : vector<64x128xf32>
    %cst_95 = arith.constant 0.000000e+00 : f32
    %144 = vector.broadcast %cst_95 : f32 to vector<64x128xf32>
    %145 = arith.maximumf %143, %144 : vector<64x128xf32>
    %146 = math.absf %143 : vector<64x128xf32>
    %cst_96 = arith.constant 0.000000e+00 : f32
    %147 = vector.broadcast %cst_96 : f32 to vector<64x128xf32>
    %148 = arith.subf %147, %146 : vector<64x128xf32>
    %149 = math.exp %148 : vector<64x128xf32>
    %150 = math.log1p %149 : vector<64x128xf32>
    %151 = arith.addf %145, %150 : vector<64x128xf32>
    %cst_97 = arith.constant 0.693147182 : f32
    %152 = vector.broadcast %cst_97 : f32 to vector<64x128xf32>
    %153 = arith.subf %151, %152 : vector<64x128xf32>
    %154 = arith.truncf %153 : vector<64x128xf32> to vector<64x128xbf16>
    %c2_98 = arith.constant 2 : index
    %c0_99 = arith.constant 0 : index
    %c0_100 = arith.constant 0 : index
    %155 = vector.load %arg7[%c2_98, %c0_99, %c0_100] : memref<3x128x128xbf16, #tpu.memory_space<vmem>>, vector<1x128x128xbf16>
    %156 = vector.shape_cast %155 : vector<1x128x128xbf16> to vector<128x128xbf16>
    %cst_101 = arith.constant dense<0.000000e+00> : vector<64x128xf32>
    %157 = tpu.matmul %154, %156, %cst_101 {dimension_numbers = #tpu.dot_dimension_numbers<[1], [0], [0], [1], [0, 0, 1, 1], [], []>} : vector<64x128xbf16>, vector<128x128xbf16>, vector<64x128xf32> -> vector<64x128xf32>
    %c2_102 = arith.constant 2 : index
    %c0_103 = arith.constant 0 : index
    %c0_104 = arith.constant 0 : index
    %158 = vector.load %arg8[%c2_102, %c0_103, %c0_104] : memref<3x1x128xf32, #tpu.memory_space<vmem>>, vector<1x1x128xf32>
    %159 = vector.shape_cast %158 : vector<1x1x128xf32> to vector<1x128xf32>
    %160 = vector.broadcast %159 : vector<1x128xf32> to vector<64x128xf32>
    %161 = arith.addf %157, %160 : vector<64x128xf32>
    %162 = arith.truncf %136 : vector<8x128xf32> to vector<8x128xbf16>
    %c2_105 = arith.constant 2 : index
    %c0_106 = arith.constant 0 : index
    %c0_107 = arith.constant 0 : index
    %163 = vector.load %arg9[%c2_105, %c0_106, %c0_107] : memref<3x128x128xbf16, #tpu.memory_space<vmem>>, vector<1x128x128xbf16>
    %164 = vector.shape_cast %163 : vector<1x128x128xbf16> to vector<128x128xbf16>
    %cst_108 = arith.constant dense<0.000000e+00> : vector<8x128xf32>
    %165 = tpu.matmul %162, %164, %cst_108 {dimension_numbers = #tpu.dot_dimension_numbers<[1], [0], [0], [1], [0, 0, 1, 1], [], []>} : vector<8x128xbf16>, vector<128x128xbf16>, vector<8x128xf32> -> vector<8x128xf32>
    %166 = arith.truncf %165 : vector<8x128xf32> to vector<8x128xbf16>
    %cst_109 = arith.constant dense<0.000000e+00> : vector<64x128xf32>
    %167 = tpu.matmul %3, %166, %cst_109 {dimension_numbers = #tpu.dot_dimension_numbers<[1], [0], [0], [1], [0, 0, 1, 1], [], []>} : vector<64x8xbf16>, vector<8x128xbf16>, vector<64x128xf32> -> vector<64x128xf32>
    %168 = arith.mulf %167, %161 : vector<64x128xf32>
    %169 = vector.shape_cast %168 : vector<64x128xf32> to vector<8x8x128xf32>
    %cst_110 = arith.constant dense<0.000000e+00> : vector<8x128xf32>
    %170 = vector.multi_reduction <add>, %169, %cst_110 [1] : vector<8x8x128xf32> to vector<8x128xf32>
    %171 = arith.truncf %170 : vector<8x128xf32> to vector<8x128xbf16>
    %c2_111 = arith.constant 2 : index
    %c0_112 = arith.constant 0 : index
    %c0_113 = arith.constant 0 : index
    %172 = vector.load %arg10[%c2_111, %c0_112, %c0_113] : memref<3x128x128xbf16, #tpu.memory_space<vmem>>, vector<1x128x128xbf16>
    %173 = vector.shape_cast %172 : vector<1x128x128xbf16> to vector<128x128xbf16>
    %cst_114 = arith.constant dense<0.000000e+00> : vector<8x128xf32>
    %174 = tpu.matmul %171, %173, %cst_114 {dimension_numbers = #tpu.dot_dimension_numbers<[1], [0], [0], [1], [0, 0, 1, 1], [], []>} : vector<8x128xbf16>, vector<128x128xbf16>, vector<8x128xf32> -> vector<8x128xf32>
    %c2_115 = arith.constant 2 : index
    %c0_116 = arith.constant 0 : index
    %c0_117 = arith.constant 0 : index
    %175 = vector.load %arg11[%c2_115, %c0_116, %c0_117] : memref<3x1x128xf32, #tpu.memory_space<vmem>>, vector<1x1x128xf32>
    %176 = vector.shape_cast %175 : vector<1x1x128xf32> to vector<1x128xf32>
    %177 = vector.broadcast %176 : vector<1x128xf32> to vector<8x128xf32>
    %178 = arith.addf %174, %177 : vector<8x128xf32>
    %cst_118 = arith.constant 0.000000e+00 : f32
    %179 = vector.broadcast %cst_118 : f32 to vector<8x128xf32>
    %180 = arith.maximumf %178, %179 : vector<8x128xf32>
    %181 = math.absf %178 : vector<8x128xf32>
    %cst_119 = arith.constant 0.000000e+00 : f32
    %182 = vector.broadcast %cst_119 : f32 to vector<8x128xf32>
    %183 = arith.subf %182, %181 : vector<8x128xf32>
    %184 = math.exp %183 : vector<8x128xf32>
    %185 = math.log1p %184 : vector<8x128xf32>
    %186 = arith.addf %180, %185 : vector<8x128xf32>
    %cst_120 = arith.constant 0.693147182 : f32
    %187 = vector.broadcast %cst_120 : f32 to vector<8x128xf32>
    %188 = arith.subf %186, %187 : vector<8x128xf32>
    %189 = arith.truncf %188 : vector<8x128xf32> to vector<8x128xbf16>
    %c2_121 = arith.constant 2 : index
    %c0_122 = arith.constant 0 : index
    %c0_123 = arith.constant 0 : index
    %190 = vector.load %arg12[%c2_121, %c0_122, %c0_123] : memref<3x128x128xbf16, #tpu.memory_space<vmem>>, vector<1x128x128xbf16>
    %191 = vector.shape_cast %190 : vector<1x128x128xbf16> to vector<128x128xbf16>
    %cst_124 = arith.constant dense<0.000000e+00> : vector<8x128xf32>
    %192 = tpu.matmul %189, %191, %cst_124 {dimension_numbers = #tpu.dot_dimension_numbers<[1], [0], [0], [1], [0, 0, 1, 1], [], []>} : vector<8x128xbf16>, vector<128x128xbf16>, vector<8x128xf32> -> vector<8x128xf32>
    %c2_125 = arith.constant 2 : index
    %c0_126 = arith.constant 0 : index
    %c0_127 = arith.constant 0 : index
    %193 = vector.load %arg13[%c2_125, %c0_126, %c0_127] : memref<3x1x128xf32, #tpu.memory_space<vmem>>, vector<1x1x128xf32>
    %194 = vector.shape_cast %193 : vector<1x1x128xf32> to vector<1x128xf32>
    %195 = vector.broadcast %194 : vector<1x128xf32> to vector<8x128xf32>
    %196 = arith.addf %192, %195 : vector<8x128xf32>
    %197 = arith.addf %136, %196 : vector<8x128xf32>
    %c0_128 = arith.constant 0 : index
    %c0_129 = arith.constant 0 : index
    %c0_130 = arith.constant 0 : index
    %198 = vector.load %arg14[%c0_128, %c0_129, %c0_130] : memref<1x8x128xf32, #tpu.memory_space<vmem>>, vector<1x8x128xf32>
    %199 = vector.shape_cast %198 : vector<1x8x128xf32> to vector<8x128xf32>
    %200 = vector.shape_cast %197 : vector<8x128xf32> to vector<1x8x128xf32>
    tpu.vector_store %arg14[%c0_128, %c0_129, %c0_130], %200 {strides = array<i32>} : memref<1x8x128xf32, #tpu.memory_space<vmem>>, vector<1x8x128xf32>,
    return
  }
  func.func @transform_0(%arg0: i32) -> (i32, i32, i32) {
    %c0_i32 = arith.constant 0 : i32
    %c0_i32_0 = arith.constant 0 : i32
    %c0_i32_1 = arith.constant 0 : i32
    return %arg0, %c0_i32, %c0_i32_0 : i32, i32, i32
  }
  func.func @transform_1(%arg0: i32) -> (i32, i32, i32) {
    %c0_i32 = arith.constant 0 : i32
    %c0_i32_0 = arith.constant 0 : i32
    %c0_i32_1 = arith.constant 0 : i32
    return %arg0, %c0_i32, %c0_i32_0 : i32, i32, i32
  }
  func.func @transform_2(%arg0: i32) -> (i32, i32) {
    %c0_i32 = arith.constant 0 : i32
    %c0_i32_0 = arith.constant 0 : i32
    %c0_i32_1 = arith.constant 0 : i32
    return %c0_i32, %c0_i32_0 : i32, i32
  }
  func.func @transform_3(%arg0: i32) -> (i32, i32, i32) {
    %c0_i32 = arith.constant 0 : i32
    %c0_i32_0 = arith.constant 0 : i32
    %c0_i32_1 = arith.constant 0 : i32
    return %arg0, %c0_i32, %c0_i32_0 : i32, i32, i32
  }
  func.func @transform_4(%arg0: i32) -> (i32, i32, i32) {
    %c0_i32 = arith.constant 0 : i32
    %c0_i32_0 = arith.constant 0 : i32
    %c0_i32_1 = arith.constant 0 : i32
    %c0_i32_2 = arith.constant 0 : i32
    return %c0_i32, %c0_i32_0, %c0_i32_1 : i32, i32, i32
  }
  func.func @transform_5(%arg0: i32) -> (i32, i32, i32) {
    %c0_i32 = arith.constant 0 : i32
    %c0_i32_0 = arith.constant 0 : i32
    %c0_i32_1 = arith.constant 0 : i32
    %c0_i32_2 = arith.constant 0 : i32
    return %c0_i32, %c0_i32_0, %c0_i32_1 : i32, i32, i32
  }
  func.func @transform_6(%arg0: i32) -> (i32, i32, i32) {
    %c0_i32 = arith.constant 0 : i32
    %c0_i32_0 = arith.constant 0 : i32
    %c0_i32_1 = arith.constant 0 : i32
    %c0_i32_2 = arith.constant 0 : i32
    return %c0_i32, %c0_i32_0, %c0_i32_1 : i32, i32, i32
  }
  func.func @transform_7(%arg0: i32) -> (i32, i32, i32) {
    %c0_i32 = arith.constant 0 : i32
    %c0_i32_0 = arith.constant 0 : i32
    %c0_i32_1 = arith.constant 0 : i32
    %c0_i32_2 = arith.constant 0 : i32
    return %c0_i32, %c0_i32_0, %c0_i32_1 : i32, i32, i32
  }
  func.func @transform_8(%arg0: i32) -> (i32, i32, i32) {
    %c0_i32 = arith.constant 0 : i32
    %c0_i32_0 = arith.constant 0 : i32
    %c0_i32_1 = arith.constant 0 : i32
    %c0_i32_2 = arith.constant 0 : i32
    return %c0_i32, %c0_i32_0, %c0_i32_1 : i32, i32, i32
  }
  func.func @transform_9(%arg0: i32) -> (i32, i32, i32) {
    %c0_i32 = arith.constant 0 : i32
    %c0_i32_0 = arith.constant 0 : i32
    %c0_i32_1 = arith.constant 0 : i32
    %c0_i32_2 = arith.constant 0 : i32
    return %c0_i32, %c0_i32_0, %c0_i32_1 : i32, i32, i32
  }
  func.func @transform_10(%arg0: i32) -> (i32, i32, i32) {
    %c0_i32 = arith.constant 0 : i32
    %c0_i32_0 = arith.constant 0 : i32
    %c0_i32_1 = arith.constant 0 : i32
    %c0_i32_2 = arith.constant 0 : i32
    return %c0_i32, %c0_i32_0, %c0_i32_1 : i32, i32, i32
  }
  func.func @transform_11(%arg0: i32) -> (i32, i32, i32) {
    %c0_i32 = arith.constant 0 : i32
    %c0_i32_0 = arith.constant 0 : i32
    %c0_i32_1 = arith.constant 0 : i32
    %c0_i32_2 = arith.constant 0 : i32
    return %c0_i32, %c0_i32_0, %c0_i32_1 : i32, i32, i32
  }
  func.func @transform_12(%arg0: i32) -> (i32, i32, i32) {
    %c0_i32 = arith.constant 0 : i32
    %c0_i32_0 = arith.constant 0 : i32
    %c0_i32_1 = arith.constant 0 : i32
    %c0_i32_2 = arith.constant 0 : i32
    return %c0_i32, %c0_i32_0, %c0_i32_1 : i32, i32, i32
  }
  func.func @transform_13(%arg0: i32) -> (i32, i32, i32) {
    %c0_i32 = arith.constant 0 : i32
    %c0_i32_0 = arith.constant 0 : i32
    %c0_i32_1 = arith.constant 0 : i32
    return %arg0, %c0_i32, %c0_i32_0 : i32, i32, i32
  }
}

</mosaic_0001>

<bundles_post_ra>
// kernel: tpu_custom_call.1
= control target key start
LH: loop header
LB: loop body
LE: loop exit
PB: predicated region body
PF: predicated region fallthrough
CT: control target
= control target key end

     0   :  { %s4876_s0 = inlined_call_operand.hbm [shape: f32[2,8,128], index: 0, kind: input, shape index: {}]   ;;  %s4877_s1 = inlined_call_operand.vmem [shape: f32[2,64,1], index: 1, kind: input, shape index: {}]   ;;  %s4878_s2 = inlined_call_operand.vmem [shape: f32[1,128], index: 2, kind: input, shape index: {}]   ;;  %s4879_s3 = inlined_call_operand.vmem [shape: bf16[2,64,8], index: 3, kind: input, shape index: {}]   ;;  %s4880_s4 = inlined_call_operand.vmem [shape: bf16[3,128,128], index: 4, kind: input, shape index: {}]   ;;  %s4881_s5 = inlined_call_operand.vmem [shape: f32[3,1,128], index: 5, kind: input, shape index: {}]   ;;  %s4882_s6 = inlined_call_operand.hbm [shape: bf16[3,128,128], index: 6, kind: input, shape index: {}]   ;;  %s4883_s7 = inlined_call_operand.vmem [shape: f32[3,1,128], index: 7, kind: input, shape index: {}]   ;;  %s4884_s8 = inlined_call_operand.hbm [shape: bf16[3,128,128], index: 8, kind: input, shape index: {}]   ;;  %s4885_s9 = inlined_call_operand.hbm [shape: bf16[3,128,128], index: 9, kind: input, shape index: {}]   ;;  %s4886_s10 = inlined_call_operand.vmem [shape: f32[3,1,128], index: 10, kind: input, shape index: {}]   ;;  %s4887_s11 = inlined_call_operand.hbm [shape: bf16[3,128,128], index: 11, kind: input, shape index: {}]   ;;  %s4888_s12 = inlined_call_operand.vmem [shape: f32[3,1,128], index: 12, kind: input, shape index: {}]   ;;  %s4889_s13 = inlined_call_operand.hbm [shape: f32[2,8,128], index: 13, kind: output, shape index: {}]  }
   0x1   :  { %4894 = sst [smem:[#allocation20_spill]] %s4882_s6 }
   0x2   :  { %4895 = sst [smem:[#allocation21_spill]] %s4884_s8 }
   0x3   :  { %4896 = sst [smem:[#allocation22_spill]] %s4885_s9 }
   0x4   :  { %4897 = sst [smem:[#allocation23_spill]] %s4887_s11 }
   0x5   :  { %18 = vsyncpa [#allocation3], 0 }
   0x6   :  { %20 = vsyncpa [#allocation3 + $0x1], 0 }
   0x7   :  { %21 = vsyncpa [#allocation6], 0 }
   0x8   :  { %22 = vsyncpa [#allocation9], 0 }
   0x9   :  { %23 = vsyncpa [#allocation4], 0 }
   0xa   :  { %25 = vsyncpa [#allocation4 + $0x1], 0  ;;  %s4259_s25 = smov 0   ;;  %s4261_s26 = smov 0  }
   0xb   :  { %s4263_s27 = smov 0   ;;  %s4265_s28 = smov 0  }
   0xc LB: > { %4898 = sst [smem:[#allocation16_spill]] %s4176_s27  ;;  %s4283_s15 = sadd.s32 4294967295, %s4180_s28   ;;  %s4180_s28 = sphi %s4265_s28, %s4933_s28   ;;  %s4176_s27 = sphi %s4263_s27, %s4935_s27   ;;  %s4172_s26 = sphi %s4261_s26, %s4937_s26   ;;  %s4168_s25 = sphi %s4259_s25, %s4936_s25  }
   0xd   : > { %s4899_s6 = sld [smem:[#allocation20_spill]]  ;;  %p2997_p0 = scmp.ge.s32.totalorder %s4180_s28, 1 }
   0xe   : > { %p52_p1 = scmp.eq.s32.totalorder %s4283_s15, 0  ;;  %p350_p2 = scmp.lt.s32.totalorder %s4180_s28, 3 }
   0xf   : > { %s4182_s17 = smov [#allocation5]   ;;  %s4901_s9 = sld [smem:[#allocation22_spill]] }
  0x10   : > { %p4288_p3 = pnand %p2997_p0, %p350_p2  ;;  %s372_s18 = sshll.u32 %s4182_s17, 4  ;;  %s373_s18 = int_to_ptr.vmem [resolvable:$true] %s372_s18 }
  0x11   : > { %s4903_s8 = sld [smem:[#allocation21_spill]]  ;;  %s4183_s30 = smov [#allocation8]  }
  0x12   : > { %p3741_p4 = pneg %p4288_p3  ;;  %s403_s17 = sshll.u32 %s4183_s30, 4  ;;  %s404_s17 = int_to_ptr.vmem [resolvable:$true] %s403_s17 }
  0x13   : > { %s370_s14 = sshll.u32 %s4899_s6, 4  ;;  %s4184_s6 = smov 64   ;;  %s371_s14 = int_to_ptr.hbm [resolvable:$true] %s370_s14 }
  0x14   : > { %p4300_p6 = pnand %p3741_p4, %p52_p1  ;;  %s4185_s19 = smov 4  }
  0x15   : > { %s401_s21 = sshll.u32 %s4901_s9, 4  ;;  %s4904_s11 = sld [smem:[#allocation23_spill]]  ;;  %s402_s21 = int_to_ptr.hbm [resolvable:$true] %s401_s21 }
  0x16   : > { %3744 = dma.hbm_to_vmem [thread:$0]  (!%p4300_p6), %s371_s14, 3072, %s373_s18, [#allocation6], %s4184_s6, %s4184_s6, %s4185_s19  }
  0x17   : > { %s387_s29 = sshll.u32 %s4903_s8, 4  ;;  %s4186_s24 = smov [#allocation7]   ;;  %s388_s29 = int_to_ptr.hbm [resolvable:$true] %s387_s29 }
  0x18   : > { %3750 = dma.hbm_to_vmem [thread:$0]  (!%p4300_p6), %s402_s21, 3072, %s404_s17, [#allocation9], %s4184_s6, %s4184_s6, %s4185_s19  }
  0x19   : > { %s389_s30 = sshll.u32 %s4186_s24, 4  ;;  %s4187_s14 = smov [#allocation10]   ;;  %s390_s30 = int_to_ptr.vmem [resolvable:$true] %s389_s30 }
  0x1a   : > { %3747 = dma.hbm_to_vmem [thread:$0]  (!%p4300_p6), %s388_s29, 3072, %s390_s30, [#allocation6], %s4184_s6, %s4184_s6, %s4185_s19  }
  0x1b   : > { %s418_s23 = sshll.u32 %s4904_s11, 4  ;;  %s420_s18 = sshll.u32 %s4187_s14, 4  ;;  %s419_s23 = int_to_ptr.hbm [resolvable:$true] %s418_s23  ;;  %s421_s18 = int_to_ptr.vmem [resolvable:$true] %s420_s18 }
  0x1c   : > { %3753 = dma.hbm_to_vmem [thread:$0]  (!%p4300_p6), %s419_s23, 3072, %s421_s18, [#allocation9], %s4184_s6, %s4184_s6, %s4185_s19  }
  0x1d   : > { %s2996_s9 = sadd.s32 4294967294, %s4180_s28   ;;  %s4320_s21 = sadd.s32 1, %s4180_s28  }
  0x1e   : > { %4905 = sst [smem:[#allocation17_spill]] %s4320_s21  ;;  %s35_s17 = ssub.s32 %s4180_s28, %s4320_s21 }
  0x1f   : > { %s38_s20 = sadd.s32 1, %s4176_s27  ;;  %p36_p7 = scmp.eq.s32.totalorder %s35_s17, 0 }
  0x20   : > { %p45_p8 = scmp.ne.s32.totalorder %s4176_s27, %s4172_s26  ;;  %p46_p9 = scmp.eq.s32.totalorder %s4180_s28, 0 }
  0x21   : > { %p51_p10 = scmp.ne.s32.totalorder %s4172_s26, %s4168_s25  ;;  %p337_p13 = scmp.eq.s32.totalorder %s4283_s15, 1 }
  0x22   : > { %s4331_s29 = scalar_select %p36_p7, %s4176_s27, %s38_s20  }
  0x23   : > { %p4333_p11 = por %p46_p9, %p45_p8  ;;  %p4339_p12 = por %p52_p1, %p51_p10 }
  0x24   : > { %4906 = sst [smem:[#allocation18_spill]] %s4331_s29  ;;  %p343_p0 = scmp.eq.s32.totalorder %s2996_s9, 1 }
  0x25   : > { %p3766_p2 = scmp.lt.s32.totalorder %s4180_s28, 2  ;;  %s437_s22 = sand.u32 1, %s4176_s27  }
  0x26   : > { %p4346_p4 = por %p337_p13, %p45_p8  ;;  %p4350_p6 = por %p343_p0, %p51_p10 }
  0x27   : > { %s3003_s30 = sshll.u32 %s437_s22, 3  ;;  %s3004_s14 = sshll.u32 %s4180_s28, 3 }
  0x28   : > { %s4910_s23 = scalar_select %p4350_p6, 1, 0 }
  0x29   : > { %s445_s20 = scalar_lea.hbm %s4876_s0, %s3004_s14  ;;  %s441_s8 = scalar_lea.vmem [#allocation2], %s3003_s30 }
  0x2a   : > { %4911 = sst [smem:[#allocation19_spill]] %s4910_s23  ;;  %s449_s11 = sshll.u32 %s441_s8, 4  ;;  %s450_s11 = int_to_ptr.vmem [resolvable:$true] %s449_s11 }
  0x2b   : > { %s447_s29 = sshll.u32 %s445_s20, 4  ;;  %p4360_p7 = pnand %p3766_p2, %p4333_p11  ;;  %s448_s29 = int_to_ptr.hbm [resolvable:$true] %s447_s29 }
  0x2c   : > { %s438_s27 = scalar_lea.sflag [#allocation3], %s437_s22  ;;  %s4076_s21 = sshra.s32 %s448_s29, 4  ;;  %s4077_s21 = int_to_ptr.hbm [resolvable:$true] %s4076_s21 }
  0x2d   : > { %s4078_s23 = scalar_lea.hbm %s4077_s21, 8  ;;  %p4080_p9 = pneg %p4360_p7 }
  0x2e   : > { %p4079_p8 = scmp.ne.s32.totalorder %s4077_s21, %s4078_s23  ;;  %s4083_s14 = scalar_lea.hbm %s4876_s0, 16 }
  0x2f   : > { %p4084_p11 = scmp.lt.s32.totalorder %s4077_s21, %s4876_s0  ;;  %p4085_p0 = scmp.lt.s32.totalorder %s4083_s14, %s4078_s23 }
  0x30   : > { %p4081_p10 = pnand %p4080_p9, %p4079_p8 }
  0x31   : > { %p4086_p2 = por %p4085_p0, %p4084_p11 }
  0x32   : > { %p4082_p13 = pneg %p4081_p10 }
  0x34   : > { %p4087_p5 = pnand %p4086_p2, %p4082_p13 }
  0x36   : > { %4090 = shalt.err (!%p4087_p5)
}
  0x37   : > { %3757 = dma.hbm_to_vmem [thread:$0]  (!%p4360_p7), %s448_s29, 128, %s450_s11, %s438_s27  }
  0x38   : > { %474 = sbr.rel (%p4288_p3) target bundleno = 2184 (0x888), region = 72  ;;  %s4377_s22 = sand.u32 (!%p4288_p3), 1, %s4172_s26  }
  0x39   : > { %s3006_s17 = sshll.u32 (!%p4288_p3), %s4377_s22, 3  ;;  %s477_s20 = scalar_lea.sflag (!%p4288_p3), [#allocation3], %s4377_s22 }
  0x3a   : > { %s4383_s21 = scalar_lea.vmem (!%p4288_p3), [#allocation2], %s3006_s17 }
  0x3d   : > { %4151 = dma.done.wait (%p4339_p12), %s477_s20, 128  }
  0x3e   : > { %4153 = vsyncadd (%p4339_p12), %s477_s20, 4294967168 }
  0x3f   : > { %4155 = dma.done.wait (%p52_p1), [#allocation6], 6144  }
  0x40   : > { %4157 = vsyncadd (%p52_p1), [#allocation6], 4294961152 }
  0x41   : > { %4159 = dma.done.wait (%p52_p1), [#allocation9], 6144  }
  0x42   : > { %4161 = vsyncadd (%p52_p1), [#allocation9], 4294961152  ;;  %p554_p3 = scmp.lt.s32.totalorder %s4283_s15, 1  ;;  %v4188_v0 = vmov 0   ;;  %v3608_v4 = vld [vmem:[%s4880_s4 + $0x38] sm:$0xff]  ;;  %v3607_v5 = vld [vmem:[%s4880_s4 + $0x30] sm:$0xff] }
  0x43   : > { %3812 = vset.pattern.permute.xlu1 %v4188_v0  ;;  %3811 = vset.pattern.permute.xlu0 %v4188_v0  ;;  %v3606_v11 = vld [vmem:[%s4880_s4 + $0x28] sm:$0xff]  ;;  %v3605_v12 = vld [vmem:[%s4880_s4 + $0x20] sm:$0xff]  ;;  %v3604_v13 = vld [vmem:[%s4880_s4 + $0x18] sm:$0xff]  ;;  %vm1108_vm0 = vcmask 1043456   ;;  %vm1095_vm1 = vcmask 64512   ;;  %s3592_s9 = sshll.u32 %s4283_s15, 3 }
  0x44   : > { %s4399_s11 = scalar_select %p554_p3, %s4283_s15, 1  ;;  %3813 = vset.pattern.permute.xlu2 %v4188_v0  ;;  %738 = vmatpush.bf16.msra.mxu0 %v3608_v4  ;;  %v3624_v14 = vld [vmem:[#allocation7 + $0x38] sm:$0xff]  ;;  %v3603_v15 = vld [vmem:[%s4880_s4 + $0x10] sm:$0xff]  ;;  %v3623_v16 = vld [vmem:[#allocation7 + $0x30] sm:$0xff] }
  0x45   : > { %1061 = vmatpush.bf16.msra.mxu2 %v3624_v14  ;;  %v3602_v17 = vld [vmem:[%s4880_s4 + $0x8] sm:$0xff]  ;;  %v3622_v18 = vld [vmem:[#allocation7 + $0x28] sm:$0xff]  ;;  %v3601_v19 = vld [vmem:[%s4880_s4] sm:$0xff]  ;;  %s553_s24 = scalar_lea.vmem [#allocation11], %s3006_s17  ;;  %s2849_s15 = scalar_lea.sflag [#allocation4], %s4377_s22 }
  0x46   : > { %s3595_s27 = sshll.u32 %s4399_s11, 6  ;;  %v3621_v20 = vld [vmem:[#allocation7 + $0x20] sm:$0xff]  ;;  %v3620_v21 = vld [vmem:[#allocation7 + $0x18] sm:$0xff]  ;;  %v4432_v22 = vld [vmem:[%s4878_s2] ss:$0 sm:$0xff]  ;;  %s3596_s30 = sshll.u32 %s4399_s11, 5 }
  0x47   : > { %s558_s6 = scalar_lea.vmem %s4877_s1, %s3595_s27  ;;  %v3619_v23 = vld [vmem:[#allocation7 + $0x10] sm:$0xff]  ;;  %v3618_v26 = vld [vmem:[#allocation7 + $0x8] sm:$0xff]  ;;  %v3617_v29 = vld [vmem:[#allocation7] sm:$0xff]  ;;  %s4511_s18 = scalar_lea.vmem %s4879_s3, %s3596_s30 }
  0x48   : > { %v576_v1 = vld [vmem:[%s558_s6 + $0x10] sm:$0xff]  ;;  %v574_v2 = vld [vmem:[%s558_s6] sm:$0xff]  ;;  %v577_v6 = vld [vmem:[%s558_s6 + $0x18] sm:$0xff]  ;;  %739 = vmatpush.bf16.msra.mxu0 %v3607_v5  ;;  %s2861_s20 = sshll.u32 %s553_s24, 4  ;;  %s4126_s17 = scalar_lea.hbm %s4889_s13, 16  ;;  %s2862_s20 = int_to_ptr.vmem [resolvable:$true] %s2861_s20 }
  0x49   : > { %595 = vperm.xlu1 %3812, %v576_v1   ;;  %585 = vperm.xlu0 %3811, %v574_v2   ;;  %v578_v3 = vld [vmem:[%s558_s6 + $0x20] sm:$0xff]  ;;  %v575_v7 = vld [vmem:[%s558_s6 + $0x8] sm:$0xff]  ;;  %v581_v9 = vld [vmem:[%s558_s6 + $0x38] sm:$0xff] }
  0x4a   : > { %605 = vperm.xlu2 %3813, %v578_v3   ;;  %v579_v8 = vld [vmem:[%s558_s6 + $0x28] sm:$0xff]  ;;  %v580_v10 = vld [vmem:[%s558_s6 + $0x30] sm:$0xff]  ;;  %1062 = vmatpush.bf16.msra.mxu2 %v3623_v16  ;;  %v3648_v50 = vld [vmem:[%s4880_s4 + $0x78] sm:$0xff] }
  0x4b   : > { %v565_v33 = vld [vmem:[%s4383_s21] sm:$0xff]  ;;  %v3647_v53 = vld [vmem:[%s4880_s4 + $0x70] sm:$0xff]  ;;  %v3644_v2 = vld [vmem:[%s4880_s4 + $0x58] sm:$0xff] }
  0x4c   : > { %740 = vmatpush.bf16.msra.mxu0 %v3606_v11  ;;  %v996_v34 = vpack.c.bf16 %v565_v33, %v565_v33  ;;  %v3646_v57 = vld [vmem:[%s4880_s4 + $0x68] sm:$0xff]  ;;  %v3645_v60 = vld [vmem:[%s4880_s4 + $0x60] sm:$0xff] }
  0x4d   : > { %v3615_v33 = vld [vmem:[#allocation5 + $0x30] sm:$0xff] }
  0x4e   : > { %1063 = vmatpush.bf16.msra.mxu2 %v3622_v18 }
  0x50   : > { %741 = vmatpush.bf16.msra.mxu0 %v3605_v12 }
  0x51   : > { %600 = vperm.xlu1 %3812, %v577_v6   ;;  %590 = vperm.xlu0 %3811, %v575_v7   ;;  %v3643_v6 = vld [vmem:[%s4880_s4 + $0x50] sm:$0xff] }
  0x52   : > { %610 = vperm.xlu2 %3813, %v579_v8   ;;  %1064 = vmatpush.bf16.msra.mxu2 %v3621_v20 }
  0x54   : > { %742 = vmatpush.bf16.msra.mxu0 %v3604_v13  ;;  %v3641_v13 = vld [vmem:[%s4880_s4 + $0x40] sm:$0xff] }
  0x56   : > { %1065 = vmatpush.bf16.msra.mxu2 %v3620_v21 }
  0x58   : > { %743 = vmatpush.bf16.msra.mxu0 %v3603_v15 }
  0x59   : > { %620 = vperm.xlu1 %3812, %v581_v9   ;;  %615 = vperm.xlu0 %3811, %v580_v10   ;;  %v3642_v10 = vld [vmem:[%s4880_s4 + $0x48] sm:$0xff] }
  0x5a   : > { %1066 = vmatpush.bf16.msra.mxu2 %v3619_v23 }
  0x5c   : > { %744 = vmatpush.bf16.msra.mxu0 %v3602_v17 }
  0x5e   : > { %1067 = vmatpush.bf16.msra.mxu2 %v3618_v26  ;;  %v3686_v26 = vld [vmem:[%s4880_s4 + $0xa8] sm:$0xff] }
  0x60   : > { %745 = vmatpush.bf16.msra.mxu0 %v3601_v19 }
  0x62   : > { %1068 = vmatpush.bf16.msra.mxu2 %v3617_v29  ;;  %v3683_v29 = vld [vmem:[%s4880_s4 + $0x90] sm:$0xff] }
  0x64   : > { %1487 = vmatpush.bf16.msrb.mxu0 %v3648_v50  ;;  %v3609_v50 = vld [vmem:[#allocation5] sm:$0xff] }
  0x65   : > { %1069 = vmatmul.bf16.vlgmr.msra.gmra.mxu2 %v996_v34  ;;  %v3614_v34 = vld [vmem:[#allocation5 + $0x28] sm:$0xff] }
  0x68   : > { %1488 = vmatpush.bf16.msrb.mxu0 %v3647_v53 }
  0x6c   : > { %1489 = vmatpush.bf16.msrb.mxu0 %v3646_v57 }
  0x70   : > { %1490 = vmatpush.bf16.msrb.mxu0 %v3645_v60 }
  0x74   : > { %1491 = vmatpush.bf16.msrb.mxu0 %v3644_v2 }
  0x78   : > { %1492 = vmatpush.bf16.msrb.mxu0 %v3643_v6 }
  0x7c   : > { %1493 = vmatpush.bf16.msrb.mxu0 %v3642_v10 }
  0x80   : > { %1494 = vmatpush.bf16.msrb.mxu0 %v3641_v13 }
  0xa4   : > { %v606_v43 = vpop.permute.xlu2 %605 }
  0xa5   : > { %v630_v55 = vsub.f32 %v606_v43, %v4432_v22 }
  0xa7   : > { %v638_v58 = vmul.f32 -11.52, %v630_v55 }
  0xa9   : > { %v646_v63 = vmul.f32 %v638_v58, %v630_v55  ;;  %v3598_v55 = vld [vmem:[%s4511_s18 + $0x8] sm:$0xff] }
  0xab   : > { %v658_v3 = vmul.f32 1.442695, %v646_v63 }
  0xac   : > { %v611_v54 = vpop.permute.xlu2 %610 }
  0xad   : > { %v631_v56 = vsub.f32 %v611_v54, %v4432_v22 }
  0xaf   : > { %v639_v59 = vmul.f32 -11.52, %v631_v56 }
  0xb1   : > { %v647_v0 = vmul.f32 %v639_v59, %v631_v56 }
  0xb3   : > { %v660_v5 = vmul.f32 1.442695, %v647_v0 }
  0xbb   : > { %v586_v24 = vpop.permute.xlu0 %585  ;;  %v596_v27 = vpop.permute.xlu1 %595 }
  0xbc   : > { %v626_v25 = vsub.f32 %v586_v24, %v4432_v22  ;;  %v628_v38 = vsub.f32 %v596_v27, %v4432_v22  ;;  %v3688_v24 = vld [vmem:[%s4880_s4 + $0xb8] sm:$0xff]  ;;  %v3685_v27 = vld [vmem:[%s4880_s4 + $0xa0] sm:$0xff] }
  0xbe   : > { %v634_v28 = vmul.f32 -11.52, %v626_v25  ;;  %v636_v42 = vmul.f32 -11.52, %v628_v38 }
  0xc0   : > { %v642_v31 = vmul.f32 %v634_v28, %v626_v25  ;;  %v644_v46 = vmul.f32 %v636_v42, %v628_v38  ;;  %v3687_v25 = vld [vmem:[%s4880_s4 + $0xb0] sm:$0xff]  ;;  %v3684_v28 = vld [vmem:[%s4880_s4 + $0x98] sm:$0xff]  ;;  %v3612_v38 = vld [vmem:[#allocation5 + $0x18] sm:$0xff] }
  0xc1   : > { %v3611_v42 = vld [vmem:[#allocation5 + $0x10] sm:$0xff] }
  0xc2   : > { %v650_v36 = vmul.f32 1.442695, %v642_v31  ;;  %v654_v51 = vmul.f32 1.442695, %v644_v46  ;;  %v3681_v31 = vld [vmem:[%s4880_s4 + $0x80] sm:$0xff]  ;;  %v3610_v46 = vld [vmem:[#allocation5 + $0x8] sm:$0xff] }
  0xc3   : > { %v591_v30 = vpop.permute.xlu0 %590  ;;  %v601_v39 = vpop.permute.xlu1 %600 }
  0xc4   : > { %v627_v32 = vsub.f32 %v591_v30, %v4432_v22  ;;  %v629_v41 = vsub.f32 %v601_v39, %v4432_v22  ;;  %3827 = vpow2.f32 %v650_v36  ;;  %v3682_v30 = vld [vmem:[%s4880_s4 + $0x88] sm:$0xff] }
  0xc6   : > { %v635_v35 = vmul.f32 -11.52, %v627_v32  ;;  %v637_v44 = vmul.f32 -11.52, %v629_v41 }
  0xc8   : > { %v643_v37 = vmul.f32 %v635_v35, %v627_v32  ;;  %v645_v48 = vmul.f32 %v637_v44, %v629_v41  ;;  %v3616_v32 = vld [vmem:[#allocation5 + $0x38] sm:$0xff]  ;;  %v3613_v35 = vld [vmem:[#allocation5 + $0x20] sm:$0xff]  ;;  %v4518_v41 = vld [vmem:[%s4881_s5] ss:$0 sm:$0xff] }
  0xc9   : > { %967 = vmatpush.bf16.msra.mxu1 %v3616_v32 }
  0xca   : > { %v652_v40 = vmul.f32 1.442695, %v643_v37  ;;  %v3828_v45 = vpop.eup %3827  ;;  %v656_v52 = vmul.f32 1.442695, %v645_v48 }
  0xcb   : > { %v621_v4 = vpop.permute.xlu1 %620  ;;  %v616_v7 = vpop.permute.xlu0 %615 }
  0xcc   : > { %3829 = vpow2.f32 %v652_v40  ;;  %v633_v8 = vsub.f32 %v621_v4, %v4432_v22  ;;  %v632_v9 = vsub.f32 %v616_v7, %v4432_v22  ;;  %v3597_v40 = vld [vmem:[%s4511_s18] sm:$0xff] }
  0xcd   : > { %3831 = vpow2.f32 %v654_v51  ;;  %968 = vmatpush.bf16.msra.mxu1 %v3615_v33 }
  0xce   : > { %3833 = vpow2.f32 %v656_v52  ;;  %v641_v11 = vmul.f32 -11.52, %v633_v8  ;;  %v640_v12 = vmul.f32 -11.52, %v632_v9 }
  0xcf   : > { %3835 = vpow2.f32 %v658_v3 }
  0xd0   : > { %3837 = vpow2.f32 %v660_v5  ;;  %v649_v16 = vmul.f32 %v641_v11, %v633_v8  ;;  %v648_v17 = vmul.f32 %v640_v12, %v632_v9 }
  0xd1   : > { %969 = vmatpush.bf16.msra.mxu1 %v3614_v34 }
  0xd2   : > { %v3830_v47 = vpop.eup %3829  ;;  %v664_v19 = vmul.f32 1.442695, %v649_v16  ;;  %v662_v20 = vmul.f32 1.442695, %v648_v17 }
  0xd3   : > { %v4439_v49 = vpack.c.bf16 %v3830_v47, %v3828_v45  ;;  %v3832_v61 = vpop.eup %3831 }
  0xd4   : > { %v3834_v62 = vpop.eup %3833  ;;  %3839 = vpow2.f32 %v664_v19 }
  0xd5   : > { %746 = vmatmul.bf16.vlgmr.msra.gmra.mxu0 %v4439_v49  ;;  %v4456_v1 = vpack.c.bf16 %v3834_v62, %v3832_v61  ;;  %v3836_v14 = vpop.eup %3835  ;;  %3841 = vpow2.f32 %v662_v20  ;;  %970 = vmatpush.bf16.msra.mxu1 %v3613_v35 }
  0xd6   : > { %v3838_v15 = vpop.eup %3837  ;;  %2202 = vmatpush.bf16.msra.mxu0 %v3688_v24 }
  0xd7   : > { %v4473_v18 = vpack.c.bf16 %v3838_v15, %v3836_v14 }
  0xd9   : > { %971 = vmatpush.bf16.msra.mxu1 %v3612_v38 }
  0xda   : > { %v3840_v21 = vpop.eup %3839  ;;  %2203 = vmatpush.bf16.msra.mxu0 %v3687_v25 }
  0xdb   : > { %v3842_v22 = vpop.eup %3841 }
  0xdc   : > { %v4476_v23 = vpack.c.bf16 %v3840_v21, %v3842_v22 }
  0xdd   : > { %972 = vmatpush.bf16.msra.mxu1 %v3611_v42 }
  0xde   : > { %2204 = vmatpush.bf16.msra.mxu0 %v3686_v26 }
  0xe1   : > { %973 = vmatpush.bf16.msra.mxu1 %v3610_v46 }
  0xe2   : > { %2205 = vmatpush.bf16.msra.mxu0 %v3685_v27 }
  0xe5   : > { %751 = vmatmul.bf16.gmra.mxu0 %v4456_v1  ;;  %974 = vmatpush.bf16.msra.mxu1 %v3609_v50 }
  0xe6   : > { %2206 = vmatpush.bf16.msra.mxu0 %v3684_v28 }
  0xe8   : > { %v1070_v36 = vpop.f32.mrf.mxu2 }
  0xe9   : > { %v1074_v37 = vpack.c.bf16 %v1070_v36, %v1070_v36 }
  0xea   : > { %2207 = vmatpush.bf16.msra.mxu0 %v3683_v29 }
  0xeb   : > { %v1110_v39 = vsel %vm1108_vm0, %v1074_v37, 0 }
  0xec   : > { %1119 = vmatpush.bf16.msra.mxu3 %v1110_v39 }
  0xee   : > { %2208 = vmatpush.bf16.msra.mxu0 %v3682_v30 }
  0xef   : > { %3136 = vmatmul.msk.bf16.vlgmr.msra.gmra.mxu3 %vm1095_vm1, %v3597_v40 }
  0xf0   : > { %v1072_v43 = vpop.f32.mrf.mxu2 }
  0xf2   : > { %2209 = vmatpush.bf16.msra.mxu0 %v3681_v31 }
  0xf5   : > { %756 = vmatmul.bf16.gmra.mxu0 %v4473_v18 }
  0xff   : > { %3137 = vmatmul.msk.bf16.gmra.mxu3 %vm1095_vm1, %v3598_v55 }
 0x105   : > { %761 = vmatmul.bf16.gmra.mxu0 %v4476_v23 }
 0x115   : > { %1495 = vmatmul.bf16.vlgmr.msrb.gmra.mxu0 %v4439_v49 }
 0x125   : > { %1500 = vmatmul.bf16.gmra.mxu0 %v4456_v1 }
 0x135   : > { %1505 = vmatmul.bf16.gmra.mxu0 %v4473_v18 }
 0x145   : > { %1510 = vmatmul.bf16.gmra.mxu0 %v4476_v23 }
 0x152   : > { %v747_v44 = vpop.f32.mrf.mxu0 }
 0x153   : > { %v748_v45 = vadd.f32 %v4518_v41, %v747_v44 }
 0x155   : > { %v775_v47 = vand.u32 2147483647, %v748_v45  ;;  %2210 = vmatmul.bf16.vlgmr.msra.gmra.mxu0 %v4439_v49  ;;  %v767_v22 = vmax.f32 %v748_v45, 0.0 }
 0x157   : > { %v783_v48 = vsub.f32 0.0, %v775_v47 }
 0x159   : > { %v791_v51 = vmul.f32 1.442695, %v783_v48 }
 0x15a   : > { %v749_v52 = vpop.f32.mrf.mxu0 }
 0x15b   : > { %3843 = vpow2.f32 %v791_v51  ;;  %v750_v53 = vadd.f32 %v4518_v41, %v749_v52  ;;  %v3600_v52 = vld [vmem:[%s4511_s18 + $0x18] sm:$0xff] }
 0x15d   : > { %v776_v54 = vand.u32 2147483647, %v750_v53  ;;  %v768_v29 = vmax.f32 %v750_v53, 0.0 }
 0x15f   : > { %v784_v56 = vsub.f32 0.0, %v776_v54 }
 0x161   : > { %v3844_v57 = vpop.eup %3843  ;;  %v793_v58 = vmul.f32 1.442695, %v784_v56  ;;  %v3655_v56 = vld [vmem:[#allocation5 + $0x70] sm:$0xff] }
 0x162   : > { %v752_v59 = vpop.f32.mrf.mxu0  ;;  %v807_v60 = vadd.f32 1.0, %v3844_v57  ;;  %v810_v63 = vmul.f32 -0.5, %v3844_v57  ;;  %v813_v9 = vand.u32 2147483647, %v3844_v57 }
 0x163   : > { %3845 = vpow2.f32 %v793_v58  ;;  %v4527_v49 = vadd.f32 %v4518_v41, %v752_v59 }
 0x164   : > { %3847 = vlog2.f32 %v807_v60  ;;  %v811_v7 = vadd.f32 1.0, %v810_v63  ;;  %vm4536_vm2 = vcmp.lt.f32.partialorder %v813_v9, 0.0004427343 }
 0x165   : > { %v777_v61 = vand.u32 2147483647, %v4527_v49  ;;  %2215 = vmatmul.bf16.gmra.mxu0 %v4456_v1  ;;  %v3599_v1 = vld [vmem:[%s4511_s18 + $0x10] sm:$0xff]  ;;  %v769_v63 = vmax.f32 %v4527_v49, 0.0 }
 0x166   : > { %v812_v13 = vmul.f32 %v3844_v57, %v811_v7  ;;  %3138 = vmatmul.msk.bf16.gmra.mxu3 %vm1095_vm1, %v3599_v1  ;;  %v3654_v7 = vld [vmem:[#allocation5 + $0x68] sm:$0xff] }
 0x167   : > { %v785_v62 = vsub.f32 0.0, %v777_v61 }
 0x169   : > { %v3846_v0 = vpop.eup %3845  ;;  %v795_v2 = vmul.f32 1.442695, %v785_v62 }
 0x16a   : > { %v3848_v3 = vpop.eup %3847  ;;  %v754_v4 = vpop.f32.mrf.mxu0  ;;  %v816_v5 = vadd.f32 1.0, %v3846_v0  ;;  %v819_v8 = vmul.f32 -0.5, %v3846_v0  ;;  %v822_v16 = vand.u32 2147483647, %v3846_v0 }
 0x16b   : > { %3849 = vpow2.f32 %v795_v2  ;;  %v4532_v6 = vadd.f32 %v4518_v41, %v754_v4  ;;  %v809_v11 = vmul.f32 0.6931472, %v3848_v3 }
 0x16c   : > { %3851 = vlog2.f32 %v816_v5  ;;  %v820_v14 = vadd.f32 1.0, %v819_v8  ;;  %vm823_vm3 = vcmp.lt.f32.partialorder %v822_v16, 0.0004427343 }
 0x16d   : > { %v778_v10 = vand.u32 2147483647, %v4532_v6  ;;  %v815_v20 = vsel %vm4536_vm2, %v812_v13, %v809_v11  ;;  %v770_v8 = vmax.f32 %v4532_v6, 0.0  ;;  %v3653_v13 = vld [vmem:[#allocation5 + $0x60] sm:$0xff] }
 0x16e   : > { %v821_v28 = vmul.f32 %v3846_v0, %v820_v14  ;;  %v879_v30 = vadd.f32 %v815_v20, %v767_v22 }
 0x16f   : > { %v786_v12 = vsub.f32 0.0, %v778_v10 }
 0x170   : > { %v3048_v36 = vadd.f32 -0.6931472, %v879_v30 }
 0x171   : > { %v3850_v17 = vpop.eup %3849  ;;  %v797_v19 = vmul.f32 1.442695, %v786_v12 }
 0x172   : > { %v3852_v21 = vpop.eup %3851  ;;  %v757_v24 = vpop.f32.mrf.mxu0  ;;  %v825_v25 = vadd.f32 1.0, %v3850_v17  ;;  %v828_v35 = vmul.f32 -0.5, %v3850_v17  ;;  %v831_v48 = vand.u32 2147483647, %v3850_v17 }
 0x173   : > { %3853 = vpow2.f32 %v797_v19  ;;  %v4544_v26 = vadd.f32 %v4518_v41, %v757_v24  ;;  %v818_v27 = vmul.f32 0.6931472, %v3852_v21 }
 0x174   : > { %3855 = vlog2.f32 %v825_v25  ;;  %v829_v46 = vadd.f32 1.0, %v828_v35  ;;  %vm4553_vm4 = vcmp.lt.f32.partialorder %v831_v48, 0.0004427343  ;;  %v3652_v25 = vld [vmem:[#allocation5 + $0x58] sm:$0xff] }
 0x175   : > { %v779_v31 = vand.u32 2147483647, %v4544_v26  ;;  %2220 = vmatmul.bf16.gmra.mxu0 %v4473_v18  ;;  %v824_v32 = vsel %vm823_vm3, %v821_v28, %v818_v27  ;;  %v3656_v18 = vld [vmem:[#allocation5 + $0x78] sm:$0xff] }
 0x176   : > { %v880_v33 = vadd.f32 %v824_v32, %v768_v29  ;;  %1718 = vmatpush.bf16.msrb.mxu1 %v3656_v18  ;;  %v830_v54 = vmul.f32 %v3850_v17, %v829_v46  ;;  %3139 = vmatmul.msk.bf16.gmra.mxu3 %vm1095_vm1, %v3600_v52  ;;  %v3650_v18 = vld [vmem:[#allocation5 + $0x48] sm:$0xff] }
 0x177   : > { %v787_v34 = vsub.f32 0.0, %v779_v31  ;;  %v4574_v31 = vld [vmem:[%s4881_s5 + $0x1] ss:$0 sm:$0xff] }
 0x178   : > { %v3049_v37 = vadd.f32 -0.6931472, %v880_v33 }
 0x179   : > { %v3854_v38 = vpop.eup %3853  ;;  %v799_v39 = vmul.f32 1.442695, %v787_v34 }
 0x17a   : > { %v3856_v40 = vpop.eup %3855  ;;  %v759_v42 = vpop.f32.mrf.mxu0  ;;  %v895_v43 = vpack.c.bf16 %v3049_v37, %v3048_v36  ;;  %v834_v44 = vadd.f32 1.0, %v3854_v38  ;;  %v837_v47 = vmul.f32 -0.5, %v3854_v38  ;;  %v840_v58 = vand.u32 2147483647, %v3854_v38  ;;  %1719 = vmatpush.bf16.msrb.mxu1 %v3655_v56 }
 0x17b   : > { %3857 = vpow2.f32 %v799_v39  ;;  %v4549_v45 = vadd.f32 %v4518_v41, %v759_v42  ;;  %v827_v51 = vmul.f32 0.6931472, %v3856_v40  ;;  %v771_v40 = vmax.f32 %v4544_v26, 0.0 }
 0x17c   : > { %975 = vmatmul.bf16.vlgmr.msra.gmra.mxu1 %v895_v43  ;;  %3859 = vlog2.f32 %v834_v44  ;;  %v838_v55 = vadd.f32 1.0, %v837_v47  ;;  %vm841_vm5 = vcmp.lt.f32.partialorder %v840_v58, 0.0004427343 }
 0x17d   : > { %v780_v50 = vand.u32 2147483647, %v4549_v45  ;;  %v833_v61 = vsel %vm4553_vm4, %v830_v54, %v827_v51  ;;  %v772_v48 = vmax.f32 %v4549_v45, 0.0 }
 0x17e   : > { %v839_v5 = vmul.f32 %v3854_v38, %v838_v55  ;;  %v881_v9 = vadd.f32 %v833_v61, %v769_v63  ;;  %1720 = vmatpush.bf16.msrb.mxu1 %v3654_v7  ;;  %v3649_v55 = vld [vmem:[#allocation5 + $0x40] sm:$0xff] }
 0x17f   : > { %v788_v53 = vsub.f32 0.0, %v780_v50 }
 0x180   : > { %v3050_v14 = vadd.f32 -0.6931472, %v881_v9 }
 0x181   : > { %v3858_v59 = vpop.eup %3857  ;;  %v801_v60 = vmul.f32 1.442695, %v788_v53 }
 0x182   : > { %v3860_v62 = vpop.eup %3859  ;;  %v762_v0 = vpop.f32.mrf.mxu0  ;;  %v843_v2 = vadd.f32 1.0, %v3858_v59  ;;  %v846_v12 = vmul.f32 -0.5, %v3858_v59  ;;  %1721 = vmatpush.bf16.msrb.mxu1 %v3653_v13  ;;  %v849_v27 = vand.u32 2147483647, %v3858_v59 }
 0x183   : > { %3861 = vpow2.f32 %v801_v60  ;;  %v4562_v3 = vadd.f32 %v4518_v41, %v762_v0  ;;  %v836_v4 = vmul.f32 0.6931472, %v3860_v62 }
 0x184   : > { %3863 = vlog2.f32 %v843_v2  ;;  %vm4576_vm6 = vcmp.lt.f32.partialorder %v849_v27, 0.0004427343 }
 0x185   : > { %v781_v10 = vand.u32 2147483647, %v4562_v3  ;;  %2225 = vmatmul.bf16.gmra.mxu0 %v4476_v23  ;;  %v842_v11 = vsel %vm841_vm5, %v839_v5, %v836_v4  ;;  %v847_v23 = vadd.f32 1.0, %v846_v12 }
 0x186   : > { %v882_v49 = vadd.f32 %v842_v11, %v770_v8  ;;  %1722 = vmatpush.bf16.msrb.mxu1 %v3652_v25 }
 0x187   : > { %v789_v1 = vsub.f32 0.0, %v781_v10  ;;  %v848_v32 = vmul.f32 %v3858_v59, %v847_v23 }
 0x188   : > { %v3051_v15 = vadd.f32 -0.6931472, %v882_v49 }
 0x189   : > { %v3862_v16 = vpop.eup %3861  ;;  %v803_v17 = vmul.f32 1.442695, %v789_v1 }
 0x18a   : > { %v3864_v19 = vpop.eup %3863  ;;  %v764_v6 = vpop.f32.mrf.mxu0  ;;  %v896_v20 = vpack.c.bf16 %v3051_v15, %v3050_v14  ;;  %v852_v21 = vadd.f32 1.0, %v3862_v16  ;;  %v855_v24 = vmul.f32 -0.5, %v3862_v16  ;;  %v858_v35 = vand.u32 2147483647, %v3862_v16 }
 0x18b   : > { %3865 = vpow2.f32 %v803_v17  ;;  %v4568_v22 = vadd.f32 %v4518_v41, %v764_v6  ;;  %v845_v29 = vmul.f32 0.6931472, %v3864_v19  ;;  %v3651_v41 = vld [vmem:[#allocation5 + $0x50] sm:$0xff]  ;;  %v773_v15 = vmax.f32 %v4562_v3, 0.0 }
 0x18c   : > { %980 = vmatmul.bf16.gmra.mxu1 %v896_v20  ;;  %3867 = vlog2.f32 %v852_v21  ;;  %v856_v33 = vadd.f32 1.0, %v855_v24  ;;  %vm859_vm7 = vcmp.lt.f32.partialorder %v858_v35, 0.0004427343 }
 0x18d   : > { %v782_v28 = vand.u32 2147483647, %v4568_v22  ;;  %v851_v38 = vsel %vm4576_vm6, %v848_v32, %v845_v29  ;;  %1723 = vmatpush.bf16.msrb.mxu1 %v3651_v41  ;;  %v774_v21 = vmax.f32 %v4568_v22, 0.0 }
 0x18e   : > { %v857_v47 = vmul.f32 %v3862_v16, %v856_v33  ;;  %v883_v50 = vadd.f32 %v851_v38, %v771_v40 }
 0x18f   : > { %v790_v30 = vsub.f32 0.0, %v782_v28 }
 0x190   : > { %v3052_v56 = vadd.f32 -0.6931472, %v883_v50 }
 0x191   : > { %v3866_v36 = vpop.eup %3865  ;;  %v805_v37 = vmul.f32 1.442695, %v790_v30  ;;  %1724 = vmatpush.bf16.msrb.mxu1 %v3650_v18 }
 0x192   : > { %v3868_v39 = vpop.eup %3867  ;;  %v1496_v42 = vpop.f32.mrf.mxu0  ;;  %v861_v43 = vadd.f32 1.0, %v3866_v36  ;;  %v864_v54 = vmul.f32 -0.5, %v3866_v36  ;;  %v867_v4 = vand.u32 2147483647, %v3866_v36 }
 0x193   : > { %3869 = vpow2.f32 %v805_v37  ;;  %v4584_v44 = vadd.f32 %v4574_v31, %v1496_v42  ;;  %v854_v46 = vmul.f32 0.6931472, %v3868_v39 }
 0x194   : > { %3871 = vlog2.f32 %v861_v43  ;;  %v865_v0 = vadd.f32 1.0, %v864_v54  ;;  %vm4592_vm8 = vcmp.lt.f32.partialorder %v867_v4, 0.0004427343 }
 0x195   : > { %v1524_v51 = vand.u32 2147483647, %v4584_v44  ;;  %v860_v52 = vsel %vm859_vm7, %v857_v47, %v854_v46  ;;  %1725 = vmatpush.bf16.msrb.mxu1 %v3649_v55 }
 0x196   : > { %v884_v53 = vadd.f32 %v860_v52, %v772_v48  ;;  %v866_v9 = vmul.f32 %v3866_v36, %v865_v0 }
 0x197   : > { %v1532_v26 = vsub.f32 0.0, %v1524_v51 }
 0x198   : > { %v3053_v57 = vadd.f32 -0.6931472, %v884_v53  ;;  %v1516_v53 = vmax.f32 %v4584_v44, 0.0 }
 0x199   : > { %v3870_v58 = vpop.eup %3869  ;;  %v1540_v59 = vmul.f32 1.442695, %v1532_v26 }
 0x19a   : > { %v3872_v60 = vpop.eup %3871  ;;  %v1498_v61 = vpop.f32.mrf.mxu0  ;;  %v897_v62 = vpack.c.bf16 %v3053_v57, %v3052_v56  ;;  %v870_v45 = vadd.f32 1.0, %v3870_v58  ;;  %v873_v2 = vmul.f32 -0.5, %v3870_v58  ;;  %v876_v49 = vand.u32 2147483647, %v3870_v58 }
 0x19b   : > { %3873 = vpow2.f32 %v1540_v59  ;;  %v4589_v63 = vadd.f32 %v4574_v31, %v1498_v61  ;;  %v863_v7 = vmul.f32 0.6931472, %v3872_v60 }
 0x19c   : > { %985 = vmatmul.bf16.gmra.mxu1 %v897_v62  ;;  %3875 = vlog2.f32 %v870_v45  ;;  %v874_v10 = vadd.f32 1.0, %v873_v2  ;;  %vm877_vm9 = vcmp.lt.f32.partialorder %v876_v49, 0.0004427343 }
 0x19d   : > { %v1525_v5 = vand.u32 2147483647, %v4589_v63  ;;  %v869_v13 = vsel %vm4592_vm8, %v866_v9, %v863_v7  ;;  %v1517_v59 = vmax.f32 %v4589_v63, 0.0 }
 0x19e   : > { %v875_v20 = vmul.f32 %v3870_v58, %v874_v10  ;;  %v885_v23 = vadd.f32 %v869_v13, %v773_v15 }
 0x19f   : > { %v1533_v8 = vsub.f32 0.0, %v1525_v5 }
 0x1a0   : > { %v3054_v3 = vadd.f32 -0.6931472, %v885_v23 }
 0x1a1   : > { %v3874_v1 = vpop.eup %3873  ;;  %v1542_v12 = vmul.f32 1.442695, %v1533_v8 }
 0x1a2   : > { %v3876_v14 = vpop.eup %3875  ;;  %v1556_v16 = vadd.f32 1.0, %v3874_v1  ;;  %v1501_v17 = vpop.f32.mrf.mxu0  ;;  %v1559_v28 = vmul.f32 -0.5, %v3874_v1  ;;  %v1562_v39 = vand.u32 2147483647, %v3874_v1 }
 0x1a3   : > { %3877 = vpow2.f32 %v1542_v12  ;;  %v4600_v19 = vadd.f32 %v4574_v31, %v1501_v17  ;;  %v872_v6 = vmul.f32 0.6931472, %v3876_v14 }
 0x1a4   : > { %3879 = vlog2.f32 %v1556_v16  ;;  %v1560_v37 = vadd.f32 1.0, %v1559_v28  ;;  %vm1563_vm10 = vcmp.lt.f32.partialorder %v1562_v39, 0.0004427343 }
 0x1a5   : > { %v1526_v24 = vand.u32 2147483647, %v4600_v19  ;;  %v878_v25 = vsel %vm877_vm9, %v875_v20, %v872_v6  ;;  %v3695_v6 = vld [vmem:[#allocation5 + $0xb0] sm:$0xff]  ;;  %v1518_v28 = vmax.f32 %v4600_v19, 0.0 }
 0x1a6   : > { %v886_v27 = vadd.f32 %v878_v25, %v774_v21  ;;  %v1561_v43 = vmul.f32 %v3874_v1, %v1560_v37  ;;  %v3696_v1 = vld [vmem:[#allocation5 + $0xb8] sm:$0xff] }
 0x1a7   : > { %v1534_v29 = vsub.f32 0.0, %v1526_v24  ;;  %2433 = vmatpush.bf16.msra.mxu1 %v3696_v1 }
 0x1a8   : > { %v3055_v30 = vadd.f32 -0.6931472, %v886_v27 }
 0x1a9   : > { %v3878_v32 = vpop.eup %3877  ;;  %v1544_v33 = vmul.f32 1.442695, %v1534_v29 }
 0x1aa   : > { %v3880_v41 = vpop.eup %3879  ;;  %v1565_v34 = vadd.f32 1.0, %v3878_v32  ;;  %v1503_v35 = vpop.f32.mrf.mxu0  ;;  %v898_v36 = vpack.c.bf16 %v3055_v30, %v3054_v3  ;;  %v1568_v38 = vmul.f32 -0.5, %v3878_v32  ;;  %v1571_v18 = vand.u32 2147483647, %v3878_v32 }
 0x1ab   : > { %3881 = vpow2.f32 %v1544_v33  ;;  %v4605_v22 = vadd.f32 %v4574_v31, %v1503_v35  ;;  %v1558_v40 = vmul.f32 0.6931472, %v3880_v41  ;;  %2434 = vmatpush.bf16.msra.mxu1 %v3695_v6  ;;  %v3694_v41 = vld [vmem:[#allocation5 + $0xa8] sm:$0xff] }
 0x1ac   : > { %3883 = vlog2.f32 %v1565_v34  ;;  %990 = vmatmul.bf16.gmra.mxu1 %v898_v36  ;;  %v1569_v46 = vadd.f32 1.0, %v1568_v38  ;;  %vm1572_vm11 = vcmp.lt.f32.partialorder %v1571_v18, 0.0004427343 }
 0x1ad   : > { %v1527_v42 = vand.u32 2147483647, %v4605_v22  ;;  %v1564_v50 = vsel %vm1563_vm10, %v1561_v43, %v1558_v40  ;;  %v1519_v34 = vmax.f32 %v4605_v22, 0.0  ;;  %v3693_v40 = vld [vmem:[#allocation5 + $0xa0] sm:$0xff] }
 0x1ae   : > { %v1570_v56 = vmul.f32 %v3878_v32, %v1569_v46  ;;  %v1628_v58 = vadd.f32 %v1564_v50, %v1516_v53 }
 0x1af   : > { %v1535_v47 = vsub.f32 0.0, %v1527_v42  ;;  %2435 = vmatpush.bf16.msra.mxu1 %v3694_v41 }
 0x1b0   : > { %v3254_v44 = vadd.f32 -0.6931472, %v1628_v58 }
 0x1b1   : > { %v3882_v48 = vpop.eup %3881  ;;  %v1546_v51 = vmul.f32 1.442695, %v1535_v47 }
 0x1b2   : > { %v3884_v52 = vpop.eup %3883  ;;  %v1506_v26 = vpop.f32.mrf.mxu0  ;;  %v1574_v54 = vadd.f32 1.0, %v3882_v48  ;;  %v1577_v0 = vmul.f32 -0.5, %v3882_v48  ;;  %v1580_v12 = vand.u32 2147483647, %v3882_v48 }
 0x1b3   : > { %v1567_v55 = vmul.f32 0.6931472, %v3884_v52  ;;  %3885 = vpow2.f32 %v1546_v51  ;;  %v4610_v57 = vadd.f32 %v4574_v31, %v1506_v26  ;;  %2436 = vmatpush.bf16.msra.mxu1 %v3693_v40  ;;  %v3692_v26 = vld [vmem:[#allocation5 + $0x98] sm:$0xff] }
 0x1b4   : > { %3887 = vlog2.f32 %v1574_v54  ;;  %v1578_v63 = vadd.f32 1.0, %v1577_v0  ;;  %vm4618_vm12 = vcmp.lt.f32.partialorder %v1580_v12, 0.0004427343 }
 0x1b5   : > { %v1573_v60 = vsel %vm1572_vm11, %v1570_v56, %v1567_v55  ;;  %v1528_v61 = vand.u32 2147483647, %v4610_v57 }
 0x1b6   : > { %v1629_v62 = vadd.f32 %v1573_v60, %v1517_v59  ;;  %v1579_v16 = vmul.f32 %v3882_v48, %v1578_v63  ;;  %v4637_v59 = vld [vmem:[%s4881_s5 + $0x2] ss:$0 sm:$0xff] }
 0x1b7   : > { %v1536_v45 = vsub.f32 0.0, %v1528_v61  ;;  %2437 = vmatpush.bf16.msra.mxu1 %v3692_v26 }
 0x1b8   : > { %v3255_v2 = vadd.f32 -0.6931472, %v1629_v62 }
 0x1b9   : > { %v3886_v4 = vpop.eup %3885  ;;  %v1548_v5 = vmul.f32 1.442695, %v1536_v45 }
 0x1ba   : > { %v3888_v7 = vpop.eup %3887  ;;  %v1508_v8 = vpop.f32.mrf.mxu0  ;;  %v1644_v9 = vpack.c.bf16 %v3255_v2, %v3254_v44  ;;  %v1583_v10 = vadd.f32 1.0, %v3886_v4  ;;  %v1586_v49 = vmul.f32 -0.5, %v3886_v4  ;;  %v1589_v21 = vand.u32 2147483647, %v3886_v4 }
 0x1bb   : > { %3889 = vpow2.f32 %v1548_v5  ;;  %v4615_v11 = vadd.f32 %v4574_v31, %v1508_v8  ;;  %v1576_v14 = vmul.f32 0.6931472, %v3888_v7  ;;  %v1520_v5 = vmax.f32 %v4610_v57, 0.0 }
 0x1bc   : > { %1726 = vmatmul.bf16.vlgmr.msrb.gmra.mxu1 %v1644_v9  ;;  %3891 = vlog2.f32 %v1583_v10  ;;  %v1587_v17 = vadd.f32 1.0, %v1586_v49  ;;  %vm1590_vm13 = vcmp.lt.f32.partialorder %v1589_v21, 0.0004427343  ;;  %v3690_v49 = vld [vmem:[#allocation5 + $0x88] sm:$0xff] }
 0x1bd   : > { %v1529_v13 = vand.u32 2147483647, %v4615_v11  ;;  %v1582_v25 = vsel %vm4618_vm12, %v1579_v16, %v1576_v14  ;;  %v1521_v1 = vmax.f32 %v4615_v11, 0.0  ;;  %vm1241_vm12 = vcmask 1041409  }
 0x1be   : > { %v1588_v33 = vmul.f32 %v3886_v4, %v1587_v17  ;;  %v1630_v35 = vadd.f32 %v1582_v25, %v1518_v28  ;;  %v3689_v17 = vld [vmem:[#allocation5 + $0x80] sm:$0xff] }
 0x1bf   : > { %v1537_v15 = vsub.f32 0.0, %v1529_v13 }
 0x1c0   : > { %v3256_v42 = vadd.f32 -0.6931472, %v1630_v35 }
 0x1c1   : > { %v3890_v23 = vpop.eup %3889  ;;  %v1550_v24 = vmul.f32 1.442695, %v1537_v15 }
 0x1c2   : > { %v3892_v27 = vpop.eup %3891  ;;  %v1511_v29 = vpop.f32.mrf.mxu0  ;;  %v1592_v3 = vadd.f32 1.0, %v3890_v23  ;;  %v1595_v39 = vmul.f32 -0.5, %v3890_v23  ;;  %v1598_v54 = vand.u32 2147483647, %v3890_v23 }
 0x1c3   : > { %3893 = vpow2.f32 %v1550_v24  ;;  %v4626_v30 = vadd.f32 %v4574_v31, %v1511_v29  ;;  %v1585_v32 = vmul.f32 0.6931472, %v3892_v27 }
 0x1c4   : > { %3895 = vlog2.f32 %v1592_v3  ;;  %v1596_v52 = vadd.f32 1.0, %v1595_v39  ;;  %vm4639_vm14 = vcmp.lt.f32.partialorder %v1598_v54, 0.0004427343 }
 0x1c5   : > { %v1530_v36 = vand.u32 2147483647, %v4626_v30  ;;  %v1591_v37 = vsel %vm1590_vm13, %v1588_v33, %v1585_v32  ;;  %vm1243_vm13 = vcmask 1042434  }
 0x1c6   : > { %v1631_v38 = vadd.f32 %v1591_v37, %v1519_v34  ;;  %v1597_v60 = vmul.f32 %v3890_v23, %v1596_v52 }
 0x1c7   : > { %v1538_v19 = vsub.f32 0.0, %v1530_v36 }
 0x1c8   : > { %v3257_v43 = vadd.f32 -0.6931472, %v1631_v38 }
 0x1c9   : > { %v3894_v46 = vpop.eup %3893  ;;  %v1552_v47 = vmul.f32 1.442695, %v1538_v19 }
 0x1ca   : > { %v3896_v18 = vpop.eup %3895  ;;  %v1513_v48 = vpop.f32.mrf.mxu0  ;;  %v1645_v50 = vpack.c.bf16 %v3257_v43, %v3256_v42  ;;  %v1601_v22 = vadd.f32 1.0, %v3894_v46  ;;  %v1604_v53 = vmul.f32 -0.5, %v3894_v46  ;;  %v1607_v45 = vand.u32 2147483647, %v3894_v46 }
 0x1cb   : > { %3897 = vpow2.f32 %v1552_v47  ;;  %v4631_v51 = vadd.f32 %v4574_v31, %v1513_v48  ;;  %v1594_v56 = vmul.f32 0.6931472, %v3896_v18  ;;  %v3691_v31 = vld [vmem:[#allocation5 + $0x90] sm:$0xff]  ;;  %v1522_v43 = vmax.f32 %v4626_v30, 0.0 }
 0x1cc   : > { %1731 = vmatmul.bf16.gmra.mxu1 %v1645_v50  ;;  %3899 = vlog2.f32 %v1601_v22  ;;  %v1605_v61 = vadd.f32 1.0, %v1604_v53  ;;  %vm1608_vm15 = vcmp.lt.f32.partialorder %v1607_v45, 0.0004427343 }
 0x1cd   : > { %v1531_v55 = vand.u32 2147483647, %v4631_v51  ;;  %v1600_v2 = vsel %vm4639_vm14, %v1597_v60, %v1594_v56  ;;  %2438 = vmatpush.bf16.msra.mxu1 %v3691_v31  ;;  %v1523_v22 = vmax.f32 %v4631_v51, 0.0  ;;  %vm1245_vm14 = vcmask 1043459  }
 0x1ce   : > { %v1606_v63 = vmul.f32 %v3894_v46, %v1605_v61  ;;  %v1632_v12 = vadd.f32 %v1600_v2, %v1520_v5 }
 0x1cf   : > { %v1539_v58 = vsub.f32 0.0, %v1531_v55 }
 0x1d0   : > { %v3258_v6 = vadd.f32 -0.6931472, %v1632_v12 }
 0x1d1   : > { %v3898_v0 = vpop.eup %3897  ;;  %v1554_v44 = vmul.f32 1.442695, %v1539_v58  ;;  %2439 = vmatpush.bf16.msra.mxu1 %v3690_v49 }
 0x1d2   : > { %v3900_v4 = vpop.eup %3899  ;;  %v2211_v7 = vpop.f32.mrf.mxu0  ;;  %v1610_v8 = vadd.f32 1.0, %v3898_v0  ;;  %v1613_v16 = vmul.f32 -0.5, %v3898_v0  ;;  %v1616_v32 = vand.u32 2147483647, %v3898_v0 }
 0x1d3   : > { %3901 = vpow2.f32 %v1554_v44  ;;  %v4647_v9 = vadd.f32 %v4637_v59, %v2211_v7  ;;  %v1603_v10 = vmul.f32 0.6931472, %v3900_v4 }
 0x1d4   : > { %3903 = vlog2.f32 %v1610_v8  ;;  %v1614_v29 = vadd.f32 1.0, %v1613_v16  ;;  %vm4655_vm2 = vcmp.lt.f32.partialorder %v1616_v32, 0.0004427343  ;;  %v4671_v8 = vpop.f32.mrf.mxu3 }
 0x1d5   : > { %v2239_v13 = vand.u32 2147483647, %v4647_v9  ;;  %v1609_v14 = vsel %vm1608_vm15, %v1606_v63, %v1603_v10  ;;  %2440 = vmatpush.bf16.msra.mxu1 %v3689_v17  ;;  %vm1247_vm15 = vcmask 1044484  }
 0x1d6   : > { %v1633_v15 = vadd.f32 %v1609_v14, %v1521_v1  ;;  %v1615_v35 = vmul.f32 %v3898_v0, %v1614_v29 }
 0x1d7   : > { %v2247_v57 = vsub.f32 0.0, %v2239_v13 }
 0x1d8   : > { %v3259_v20 = vadd.f32 -0.6931472, %v1633_v15 }
 0x1d9   : > { %v3902_v21 = vpop.eup %3901  ;;  %v2255_v23 = vmul.f32 1.442695, %v2247_v57  ;;  %v2231_v57 = vmax.f32 %v4647_v9, 0.0 }
 0x1da   : > { %v3904_v24 = vpop.eup %3903  ;;  %v2213_v25 = vpop.f32.mrf.mxu0  ;;  %v1646_v27 = vpack.c.bf16 %v3259_v20, %v3258_v6  ;;  %v1619_v11 = vadd.f32 1.0, %v3902_v21  ;;  %v1622_v3 = vmul.f32 -0.5, %v3902_v21  ;;  %v1625_v38 = vand.u32 2147483647, %v3902_v21 }
 0x1db   : > { %3905 = vpow2.f32 %v2255_v23  ;;  %v4652_v28 = vadd.f32 %v4637_v59, %v2213_v25  ;;  %v1612_v41 = vmul.f32 0.6931472, %v3904_v24 }
 0x1dc   : > { %1736 = vmatmul.bf16.gmra.mxu1 %v1646_v27  ;;  %3907 = vlog2.f32 %v1619_v11  ;;  %v1623_v36 = vadd.f32 1.0, %v1622_v3  ;;  %vm1626_vm3 = vcmp.lt.f32.partialorder %v1625_v38, 0.0004427343  ;;  %v4679_v3 = vpop.f32.mrf.mxu3 }
 0x1dd   : > { %v2240_v33 = vand.u32 2147483647, %v4652_v28  ;;  %v1618_v40 = vsel %vm4655_vm2, %v1615_v35, %v1612_v41  ;;  %v2232_v24 = vmax.f32 %v4652_v28, 0.0  ;;  %vm1249_vm2 = vcmask 1045509  }
 0x1de   : > { %v1624_v50 = vmul.f32 %v3902_v21, %v1623_v36  ;;  %v1634_v52 = vadd.f32 %v1618_v40, %v1522_v43 }
 0x1df   : > { %v2248_v34 = vsub.f32 0.0, %v2240_v33 }
 0x1e0   : > { %v3260_v30 = vadd.f32 -0.6931472, %v1634_v52 }
 0x1e1   : > { %v3906_v19 = vpop.eup %3905  ;;  %v2257_v39 = vmul.f32 1.442695, %v2248_v34 }
 0x1e2   : > { %v3908_v42 = vpop.eup %3907  ;;  %v2271_v46 = vadd.f32 1.0, %v3906_v19  ;;  %v2216_v47 = vpop.f32.mrf.mxu0  ;;  %v2274_v55 = vmul.f32 -0.5, %v3906_v19  ;;  %v2277_v4 = vand.u32 2147483647, %v3906_v19 }
 0x1e3   : > { %3909 = vpow2.f32 %v2257_v39  ;;  %v4663_v18 = vadd.f32 %v4637_v59, %v2216_v47  ;;  %v1621_v48 = vmul.f32 0.6931472, %v3908_v42 }
 0x1e4   : > { %3911 = vlog2.f32 %v2271_v46  ;;  %v2275_v44 = vadd.f32 1.0, %v2274_v55  ;;  %vm2278_vm4 = vcmp.lt.f32.partialorder %v2277_v4, 0.0004427343  ;;  %v4693_v55 = vpop.f32.mrf.mxu3 }
 0x1e5   : > { %v2241_v53 = vand.u32 2147483647, %v4663_v18  ;;  %v1627_v26 = vsel %vm1626_vm3, %v1624_v50, %v1621_v48  ;;  %vm1251_vm3 = vcmask 1046534  }
 0x1e6   : > { %v1635_v54 = vadd.f32 %v1627_v26, %v1523_v22  ;;  %v2276_v10 = vmul.f32 %v3906_v19, %v2275_v44 }
 0x1e7   : > { %v2249_v56 = vsub.f32 0.0, %v2241_v53 }
 0x1e8   : > { %v3261_v58 = vadd.f32 -0.6931472, %v1635_v54 }
 0x1e9   : > { %v3910_v60 = vpop.eup %3909  ;;  %v2259_v61 = vmul.f32 1.442695, %v2249_v56 }
 0x1ea   : > { %v3912_v31 = vpop.eup %3911  ;;  %v2280_v62 = vadd.f32 1.0, %v3910_v60  ;;  %v2218_v45 = vpop.f32.mrf.mxu0  ;;  %v1647_v0 = vpack.c.bf16 %v3261_v58, %v3260_v30  ;;  %v2283_v2 = vmul.f32 -0.5, %v3910_v60  ;;  %v2286_v1 = vand.u32 2147483647, %v3910_v60 }
 0x1eb   : > { %3913 = vpow2.f32 %v2259_v61  ;;  %v4668_v51 = vadd.f32 %v4637_v59, %v2218_v45  ;;  %v2273_v5 = vmul.f32 0.6931472, %v3912_v31  ;;  %v2233_v58 = vmax.f32 %v4663_v18, 0.0 }
 0x1ec   : > { %3915 = vlog2.f32 %v2280_v62  ;;  %1741 = vmatmul.bf16.gmra.mxu1 %v1647_v0  ;;  %v2284_v63 = vadd.f32 1.0, %v2283_v2  ;;  %vm2287_vm5 = vcmp.lt.f32.partialorder %v2286_v1, 0.0004427343 }
 0x1ed   : > { %v2242_v7 = vand.u32 2147483647, %v4668_v51  ;;  %v2279_v13 = vsel %vm2278_vm4, %v2276_v10, %v2273_v5  ;;  %v2234_v0 = vmax.f32 %v4668_v51, 0.0  ;;  %vm1253_vm4 = vcmask 1047559  }
 0x1ee   : > { %v2285_v20 = vmul.f32 %v3910_v60, %v2284_v63  ;;  %v2343_v23 = vadd.f32 %v2279_v13, %v2231_v57  ;;  %v1128_v57 = vpop.f32.mrf.mxu3 }
 0x1ef   : > { %v2250_v49 = vsub.f32 0.0, %v2242_v7 }
 0x1f0   : > { %v3447_v32 = vadd.f32 -0.6931472, %v2343_v23 }
 0x1f1   : > { %v3914_v12 = vpop.eup %3913  ;;  %v2261_v14 = vmul.f32 1.442695, %v2250_v49 }
 0x1f2   : > { %v3916_v15 = vpop.eup %3915  ;;  %v2221_v16 = vpop.f32.mrf.mxu0  ;;  %v2289_v17 = vadd.f32 1.0, %v3914_v12  ;;  %v2292_v9 = vmul.f32 -0.5, %v3914_v12  ;;  %v2295_v42 = vand.u32 2147483647, %v3914_v12 }
 0x1f3   : > { %v2282_v6 = vmul.f32 0.6931472, %v3916_v15  ;;  %3917 = vpow2.f32 %v2261_v14  ;;  %v4675_v21 = vadd.f32 %v4637_v59, %v2221_v16 }
 0x1f4   : > { %3919 = vlog2.f32 %v2289_v17  ;;  %v2293_v39 = vadd.f32 1.0, %v2292_v9  ;;  %vm4687_vm6 = vcmp.lt.f32.partialorder %v2295_v42, 0.0004427343  ;;  %v3631_v9 = vld [vmem:[#allocation8 + $0x30] sm:$0xff] }
 0x1f5   : > { %v2288_v25 = vsel %vm2287_vm5, %v2285_v20, %v2282_v6  ;;  %v2243_v27 = vand.u32 2147483647, %v4675_v21  ;;  %v3632_v20 = vld [vmem:[#allocation8 + $0x38] sm:$0xff] }
 0x1f6   : > { %v2344_v11 = vadd.f32 %v2288_v25, %v2232_v24  ;;  %v2294_v48 = vmul.f32 %v3914_v12, %v2293_v39  ;;  %1305 = vmatpush.bf16.msrb.mxu2 %v3632_v20  ;;  %v3626_v20 = vld [vmem:[#allocation8 + $0x8] sm:$0xff] }
 0x1f7   : > { %v2251_v29 = vsub.f32 0.0, %v2243_v27 }
 0x1f8   : > { %v3448_v33 = vadd.f32 -0.6931472, %v2344_v11 }
 0x1f9   : > { %v3918_v41 = vpop.eup %3917  ;;  %v2263_v34 = vmul.f32 1.442695, %v2251_v29  ;;  %v4681_v35 = vpop.f32.mrf.mxu1 }
 0x1fa   : > { %v3920_v36 = vpop.eup %3919  ;;  %v2359_v37 = vpack.c.bf16 %v3448_v33, %v3447_v32  ;;  %v2223_v38 = vpop.f32.mrf.mxu0  ;;  %v2298_v28 = vadd.f32 1.0, %v3918_v41  ;;  %v2301_v40 = vmul.f32 -0.5, %v3918_v41  ;;  %v2304_v52 = vand.u32 2147483647, %v3918_v41  ;;  %1306 = vmatpush.bf16.msrb.mxu2 %v3631_v9 }
 0x1fb   : > { %3921 = vpow2.f32 %v2263_v34  ;;  %v4684_v19 = vadd.f32 %v4637_v59, %v2223_v38  ;;  %v2291_v46 = vmul.f32 0.6931472, %v3920_v36  ;;  %v2235_v38 = vmax.f32 %v4675_v21, 0.0 }
 0x1fc   : > { %2441 = vmatmul.bf16.vlgmr.msra.gmra.mxu1 %v2359_v37  ;;  %3923 = vlog2.f32 %v2298_v28  ;;  %v2302_v50 = vadd.f32 1.0, %v2301_v40  ;;  %vm2305_vm7 = vcmp.lt.f32.partialorder %v2304_v52, 0.0004427343  ;;  %v3630_v40 = vld [vmem:[#allocation8 + $0x28] sm:$0xff]  ;;  %v3629_v52 = vld [vmem:[#allocation8 + $0x20] sm:$0xff] }
 0x1fd   : > { %v2244_v43 = vand.u32 2147483647, %v4684_v19  ;;  %v2297_v56 = vsel %vm4687_vm6, %v2294_v48, %v2291_v46  ;;  %v2236_v42 = vmax.f32 %v4684_v19, 0.0 }
 0x1fe   : > { %v2303_v45 = vmul.f32 %v3918_v41, %v2302_v50  ;;  %v2345_v44 = vadd.f32 %v2297_v56, %v2233_v58  ;;  %1307 = vmatpush.bf16.msrb.mxu2 %v3630_v40 }
 0x1ff   : > { %v2252_v47 = vsub.f32 0.0, %v2244_v43  ;;  %v1131_v43 = vpop.f32.mrf.mxu3 }
 0x200   : > { %v3449_v10 = vadd.f32 -0.6931472, %v2345_v44 }
 0x201   : > { %v3922_v53 = vpop.eup %3921  ;;  %v2265_v26 = vmul.f32 1.442695, %v2252_v47  ;;  %v4691_v54 = vpop.f32.mrf.mxu1  ;;  %v4712_v47 = vld [vmem:[%s4883_s7] ss:$0 sm:$0xff] }
 0x202   : > { %v3924_v30 = vpop.eup %3923  ;;  %v2226_v60 = vpop.f32.mrf.mxu0  ;;  %v2307_v61 = vadd.f32 1.0, %v3922_v53  ;;  %v2310_v63 = vmul.f32 -0.5, %v3922_v53  ;;  %v2313_v24 = vand.u32 2147483647, %v3922_v53  ;;  %v979_v21 = vadd.f32 %v4712_v47, %v4691_v54  ;;  %1308 = vmatpush.bf16.msrb.mxu2 %v3629_v52 }
 0x203   : > { %3925 = vpow2.f32 %v2265_v26  ;;  %v4699_v31 = vadd.f32 %v4637_v59, %v2226_v60  ;;  %v2300_v62 = vmul.f32 0.6931472, %v3924_v30  ;;  %v977_v58 = vadd.f32 %v4712_v47, %v4681_v35 }
 0x204   : > { %3927 = vlog2.f32 %v2307_v61  ;;  %v2311_v17 = vadd.f32 1.0, %v2310_v63  ;;  %vm2314_vm8 = vcmp.lt.f32.partialorder %v2313_v24, 0.0004427343  ;;  %v1142_v54 = vmul.f32 %v4679_v3, %v979_v21 }
 0x205   : > { %v2245_v2 = vand.u32 2147483647, %v4699_v31  ;;  %v2306_v4 = vsel %vm2305_vm7, %v2303_v45, %v2300_v62  ;;  %v1141_v35 = vmul.f32 %v4671_v8, %v977_v58  ;;  %v2237_v24 = vmax.f32 %v4699_v31, 0.0 }
 0x206   : > { %v2346_v5 = vadd.f32 %v2306_v4, %v2234_v0  ;;  %v2312_v11 = vmul.f32 %v3922_v53, %v2311_v17  ;;  %v3628_v4 = vld [vmem:[#allocation8 + $0x18] sm:$0xff] }
 0x207   : > { %v2253_v7 = vsub.f32 0.0, %v2245_v2  ;;  %1309 = vmatpush.bf16.msrb.mxu2 %v3628_v4  ;;  %v1149_v17 = vrot.slane %v1141_v35, 4 }
 0x208   : > { %v3450_v18 = vadd.f32 -0.6931472, %v2346_v5 }
 0x209   : > { %v3926_v49 = vpop.eup %3925  ;;  %v2267_v1 = vmul.f32 1.442695, %v2253_v7  ;;  %v981_v12 = vpop.f32.mrf.mxu1 }
 0x20a   : > { %v2228_v13 = vpop.f32.mrf.mxu0  ;;  %v2360_v14 = vpack.c.bf16 %v3450_v18, %v3449_v10  ;;  %v3928_v15 = vpop.eup %3927  ;;  %v2316_v16 = vadd.f32 1.0, %v3926_v49  ;;  %v2319_v6 = vmul.f32 -0.5, %v3926_v49  ;;  %v2322_v41 = vand.u32 2147483647, %v3926_v49 }
 0x20b   : > { %3929 = vpow2.f32 %v2267_v1  ;;  %v4704_v51 = vadd.f32 %v4637_v59, %v2228_v13  ;;  %v2309_v25 = vmul.f32 0.6931472, %v3928_v15  ;;  %v982_v19 = vadd.f32 %v4712_v47, %v981_v12 }
 0x20c   : > { %2446 = vmatmul.bf16.gmra.mxu1 %v2360_v14  ;;  %3931 = vlog2.f32 %v2316_v16  ;;  %v2320_v29 = vadd.f32 1.0, %v2319_v6  ;;  %vm2323_vm9 = vcmp.lt.f32.partialorder %v2322_v41, 0.0004427343  ;;  %v1155_v1 = vrot.slane %v1142_v54, 4  ;;  %v3627_v14 = vld [vmem:[#allocation8 + $0x10] sm:$0xff] }
 0x20d   : > { %v2246_v23 = vand.u32 2147483647, %v4704_v51  ;;  %v2315_v34 = vsel %vm2314_vm8, %v2312_v11, %v2309_v25  ;;  %v1143_v5 = vmul.f32 %v4693_v55, %v982_v19  ;;  %1310 = vmatpush.bf16.msrb.mxu2 %v3627_v14  ;;  %v1150_v41 = vadd.f32 %v1149_v17, %v1141_v35 }
 0x20e   : > { %v2321_v39 = vmul.f32 %v3926_v49, %v2320_v29  ;;  %v2347_v46 = vadd.f32 %v2315_v34, %v2235_v38  ;;  %v1133_v49 = vpop.f32.mrf.mxu3  ;;  %v3625_v38 = vld [vmem:[#allocation8] sm:$0xff] }
 0x20f   : > { %v2254_v27 = vsub.f32 0.0, %v2246_v23  ;;  %v1161_v3 = vrot.slane %v1143_v5, 4  ;;  %v1151_v21 = vrot.slane %v1150_v41, 2 }
 0x210   : > { %v3451_v56 = vadd.f32 -0.6931472, %v2347_v46 }
 0x211   : > { %v3930_v32 = vpop.eup %3929  ;;  %v2269_v33 = vmul.f32 1.442695, %v2254_v27  ;;  %v983_v59 = vpop.f32.mrf.mxu1  ;;  %v1156_v27 = vadd.f32 %v1155_v1, %v1142_v54  ;;  %1311 = vmatpush.bf16.msrb.mxu2 %v3626_v20  ;;  %v1152_v58 = vadd.f32 %v1151_v21, %v1150_v41 }
 0x212   : > { %v2325_v36 = vadd.f32 1.0, %v3930_v32  ;;  %v3932_v37 = vpop.eup %3931  ;;  %v2328_v22 = vmul.f32 -0.5, %v3930_v32  ;;  %v984_v60 = vadd.f32 %v4712_v47, %v983_v59  ;;  %v2331_v7 = vand.u32 2147483647, %v3930_v32 }
 0x213   : > { %3933 = vpow2.f32 %v2269_v33  ;;  %v2318_v28 = vmul.f32 0.6931472, %v3932_v37  ;;  %v2238_v33 = vmax.f32 %v4704_v51, 0.0  ;;  %v1157_v40 = vrot.slane %v1156_v27, 2 }
 0x214   : > { %3935 = vlog2.f32 %v2325_v36  ;;  %v2329_v44 = vadd.f32 1.0, %v2328_v22  ;;  %v1144_v10 = vmul.f32 %v1128_v57, %v984_v60  ;;  %vm4724_vm10 = vcmp.lt.f32.partialorder %v2331_v7, 0.0004427343 }
 0x215   : > { %v2324_v48 = vsel %vm2323_vm9, %v2321_v39, %v2318_v28  ;;  %1312 = vmatpush.bf16.msrb.mxu2 %v3625_v38  ;;  %v1158_v19 = vadd.f32 %v1157_v40, %v1156_v27  ;;  %v1153_v4 = vrot.slane %v1152_v58, 1 }
 0x216   : > { %v2348_v50 = vadd.f32 %v2324_v48, %v2236_v42  ;;  %v2330_v12 = vmul.f32 %v3930_v32, %v2329_v44  ;;  %v1167_v6 = vrot.slane %v1144_v10, 4  ;;  %v1162_v32 = vadd.f32 %v1161_v3, %v1143_v5 }
 0x217   : > { %v1154_v14 = vadd.f32 %v1153_v4, %v1152_v58  ;;  %v3633_v58 = vld [vmem:[#allocation10] sm:$0xff]  ;;  %v3662_v4 = vld [vmem:[#allocation7 + $0x68] sm:$0xff] }
 0x218   : > { %v3452_v30 = vadd.f32 -0.6931472, %v2348_v50  ;;  %v1168_v34 = vadd.f32 %v1167_v6, %v1144_v10  ;;  %v1163_v42 = vrot.slane %v1162_v32, 2 }
 0x219   : > { %v3934_v53 = vpop.eup %3933  ;;  %v986_v26 = vpop.f32.mrf.mxu1 }
 0x21a   : > { %v2334_v61 = vadd.f32 1.0, %v3934_v53  ;;  %v3936_v62 = vpop.eup %3935  ;;  %v987_v45 = vadd.f32 %v4712_v47, %v986_v26  ;;  %v2361_v0 = vpack.c.bf16 %v3452_v30, %v3451_v56  ;;  %v2337_v2 = vmul.f32 -0.5, %v3934_v53 }
 0x21b   : > { %v2327_v18 = vmul.f32 0.6931472, %v3936_v62  ;;  %v2340_v55 = vand.u32 2147483647, %v3934_v53  ;;  %v1169_v22 = vrot.slane %v1168_v34, 2  ;;  %v1164_v30 = vadd.f32 %v1163_v42, %v1162_v32 }
 0x21c   : > { %2451 = vmatmul.bf16.gmra.mxu1 %v2361_v0  ;;  %3937 = vlog2.f32 %v2334_v61  ;;  %v1145_v63 = vmul.f32 %v1131_v43, %v987_v45  ;;  %v2338_v13 = vadd.f32 1.0, %v2337_v2  ;;  %v1136_v43 = vpop.f32.mrf.mxu3  ;;  %v1159_v45 = vrot.slane %v1158_v19, 1 }
 0x21d   : > { %v2333_v57 = vsel %vm4724_vm10, %v2330_v12, %v2327_v18  ;;  %vm2341_vm11 = vcmp.lt.f32.partialorder %v2340_v55, 0.0004427343  ;;  %v1170_v60 = vadd.f32 %v1169_v22, %v1168_v34  ;;  %v1165_v44 = vrot.slane %v1164_v30, 1  ;;  %v3640_v22 = vld [vmem:[#allocation10 + $0x38] sm:$0xff] }
 0x21e   : > { %v1173_v25 = vrot.slane %v1145_v63, 4  ;;  %v2339_v9 = vmul.f32 %v3934_v53, %v2338_v13  ;;  %v2349_v59 = vadd.f32 %v2333_v57, %v2237_v24  ;;  %1403 = vmatpush.bf16.msrb.mxu3 %v3640_v22  ;;  %v3669_v22 = vld [vmem:[#allocation8 + $0x60] sm:$0xff] }
 0x21f   : > { %v1171_v5 = vrot.slane %v1170_v60, 1  ;;  %v1166_v13 = vadd.f32 %v1165_v44, %v1164_v30  ;;  %v3821_v30 = vld [vmem:[%s4886_s10] ss:$0 sm:$0xff] }
 0x220   : > { %v1174_v28 = vadd.f32 %v1173_v25, %v1145_v63  ;;  %v3453_v48 = vadd.f32 -0.6931472, %v2349_v59  ;;  %v1160_v63 = vadd.f32 %v1159_v45, %v1158_v19  ;;  %v3636_v19 = vld [vmem:[#allocation10 + $0x18] sm:$0xff] }
 0x221   : > { %v988_v15 = vpop.f32.mrf.mxu1  ;;  %v1172_v3 = vadd.f32 %v1171_v5, %v1170_v60  ;;  %v1199_v57 = vpack.c.bf16 %v1166_v13, %v1166_v13  ;;  %v3661_v5 = vld [vmem:[#allocation7 + $0x60] sm:$0xff] }
 0x222   : > { %v989_v8 = vadd.f32 %v4712_v47, %v988_v15  ;;  %v3938_v23 = vpop.eup %3937  ;;  %v1175_v52 = vrot.slane %v1174_v28, 2  ;;  %v1198_v17 = vpack.c.bf16 %v1160_v63, %v1160_v63  ;;  %v3659_v63 = vld [vmem:[#allocation7 + $0x50] sm:$0xff] }
 0x223   : > { %v2336_v29 = vmul.f32 0.6931472, %v3938_v23  ;;  %v1197_v23 = vpack.c.bf16 %v1154_v14, %v1154_v14  ;;  %v1200_v24 = vpack.c.bf16 %v1172_v3, %v1172_v3 }
 0x224   : > { %v1146_v11 = vmul.f32 %v1133_v49, %v989_v8  ;;  %v1176_v62 = vadd.f32 %v1175_v52, %v1174_v28  ;;  %v1138_v18 = vpop.f32.mrf.mxu3  ;;  %v1234_v27 = vunpack.c.l.b16 %v1198_v17  ;;  %v3638_v52 = vld [vmem:[#allocation10 + $0x28] sm:$0xff] }
 0x225   : > { %v2342_v37 = vsel %vm2341_vm11, %v2339_v9, %v2336_v29  ;;  %v1235_v9 = vunpack.c.l.b16 %v1199_v57  ;;  %v1236_v59 = vunpack.c.l.b16 %v1200_v24  ;;  %v3822_v57 = vld [vmem:[%s4888_s12] ss:$0 sm:$0xff] }
 0x226   : > { %v1179_v36 = vrot.slane %v1146_v11, 4  ;;  %v2350_v39 = vadd.f32 %v2342_v37, %v2238_v33  ;;  %v1177_v10 = vrot.slane %v1176_v62, 1  ;;  %v1233_v33 = vunpack.c.l.b16 %v1197_v23  ;;  %v3951_v24 = vld [vmem:[%s4383_s21] sm:$0xff] }
 0x228   : > { %v1180_v31 = vadd.f32 %v1179_v36, %v1146_v11  ;;  %v3454_v50 = vadd.f32 -0.6931472, %v2350_v39  ;;  %v1178_v55 = vadd.f32 %v1177_v10, %v1176_v62  ;;  %v1242_v36 = vsel %vm1241_vm12, %v1234_v27, %v1233_v33  ;;  %v3664_v62 = vld [vmem:[#allocation7 + $0x78] sm:$0xff] }
 0x229   : > { %v991_v46 = vpop.f32.mrf.mxu1  ;;  %v1244_v28 = vsel %vm1243_vm13, %v1235_v9, %v1242_v36  ;;  %1813 = vmatpush.bf16.msra.mxu2 %v3664_v62  ;;  %v3660_v10 = vld [vmem:[#allocation7 + $0x58] sm:$0xff] }
 0x22a   : > { %v992_v51 = vadd.f32 %v4712_v47, %v991_v46  ;;  %v2362_v53 = vpack.c.bf16 %v3454_v50, %v3453_v48  ;;  %v1181_v26 = vrot.slane %v1180_v31, 2  ;;  %v1201_v25 = vpack.c.bf16 %v1178_v55, %v1178_v55 }
 0x22c   : > { %v1147_v56 = vmul.f32 %v1136_v43, %v992_v51  ;;  %2456 = vmatmul.bf16.gmra.mxu1 %v2362_v53  ;;  %v1182_v0 = vadd.f32 %v1181_v26, %v1180_v31  ;;  %v1237_v34 = vunpack.c.l.b16 %v1201_v25  ;;  %v1246_v31 = vsel %vm1245_vm14, %v1236_v59, %v1244_v28  ;;  %v3639_v51 = vld [vmem:[#allocation10 + $0x30] sm:$0xff]  ;;  %v3637_v53 = vld [vmem:[#allocation10 + $0x20] sm:$0xff]  ;;  %v4760_v59 = vld [vmem:[%s4511_s18 + $0x8] sm:$0xff] }
 0x22d   : > { %1404 = vmatpush.bf16.msrb.mxu3 %v3639_v51  ;;  %v3635_v26 = vld [vmem:[#allocation10 + $0x10] sm:$0xff] }
 0x22e   : > { %v1185_v61 = vrot.slane %v1147_v56, 4  ;;  %v1183_v49 = vrot.slane %v1182_v0, 1  ;;  %v1248_v42 = vsel %vm1247_vm15, %v1237_v34, %v1246_v31  ;;  %v4770_v34 = vld [vmem:[%s4511_s18 + $0x18] sm:$0xff] }
 0x230   : > { %v1186_v54 = vadd.f32 %v1185_v61, %v1147_v56  ;;  %v1184_v6 = vadd.f32 %v1183_v49, %v1182_v0  ;;  %v3634_v56 = vld [vmem:[#allocation10 + $0x8] sm:$0xff]  ;;  %v3663_v0 = vld [vmem:[#allocation7 + $0x70] sm:$0xff] }
 0x231   : > { %v993_v2 = vpop.f32.mrf.mxu1  ;;  %1405 = vmatpush.bf16.msrb.mxu3 %v3638_v52  ;;  %1814 = vmatpush.bf16.msra.mxu2 %v3663_v0 }
 0x232   : > { %v1187_v7 = vrot.slane %v1186_v54, 2  ;;  %v994_v35 = vadd.f32 %v4712_v47, %v993_v2  ;;  %v1202_v11 = vpack.c.bf16 %v1184_v6, %v1184_v6  ;;  %v3658_v6 = vld [vmem:[#allocation7 + $0x48] sm:$0xff] }
 0x234   : > { %v1188_v1 = vadd.f32 %v1187_v7, %v1186_v54  ;;  %v1148_v12 = vmul.f32 %v1138_v18, %v994_v35  ;;  %v1238_v37 = vunpack.c.l.b16 %v1202_v11 }
 0x235   : > { %1406 = vmatpush.bf16.msrb.mxu3 %v3637_v53  ;;  %1815 = vmatpush.bf16.msra.mxu2 %v3662_v4 }
 0x236   : > { %v1189_v15 = vrot.slane %v1188_v1, 1  ;;  %v1191_v16 = vrot.slane %v1148_v12, 4  ;;  %v1250_v46 = vsel %vm1249_vm2, %v1238_v37, %v1248_v42  ;;  %v3672_v42 = vld [vmem:[#allocation8 + $0x78] sm:$0xff] }
 0x238   : > { %v1192_v8 = vadd.f32 %v1191_v16, %v1148_v12  ;;  %v1190_v20 = vadd.f32 %v1189_v15, %v1188_v1 }
 0x239   : > { %1407 = vmatpush.bf16.msrb.mxu3 %v3636_v19  ;;  %1816 = vmatpush.bf16.msra.mxu2 %v3661_v5  ;;  %v1727_v36 = vpop.f32.mrf.mxu1 }
 0x23a   : > { %v1193_v47 = vrot.slane %v1192_v8, 2  ;;  %v1203_v32 = vpack.c.bf16 %v1190_v20, %v1190_v20 }
 0x23c   : > { %v1194_v29 = vadd.f32 %v1193_v47, %v1192_v8  ;;  %v1239_v39 = vunpack.c.l.b16 %v1203_v32  ;;  %v3657_v8 = vld [vmem:[#allocation7 + $0x40] sm:$0xff]  ;;  %v4755_v32 = vld [vmem:[%s4511_s18] sm:$0xff] }
 0x23d   : > { %1408 = vmatpush.bf16.msrb.mxu3 %v3635_v26  ;;  %1817 = vmatpush.bf16.msra.mxu2 %v3660_v10 }
 0x23e   : > { %v1195_v41 = vrot.slane %v1194_v29, 1  ;;  %v1252_v48 = vsel %vm1251_vm3, %v1239_v39, %v1250_v46 }
 0x240   : > { %v1196_v38 = vadd.f32 %v1195_v41, %v1194_v29  ;;  %v4765_v41 = vld [vmem:[%s4511_s18 + $0x10] sm:$0xff]  ;;  %s2859_s18 = scalar_lea.hbm %s4889_s13, %s3592_s9 }
 0x241   : > { %1409 = vmatpush.bf16.msrb.mxu3 %v3634_v56  ;;  %1818 = vmatpush.bf16.msra.mxu2 %v3659_v63  ;;  %v1729_v37 = vpop.f32.mrf.mxu1  ;;  %s2863_s11 = sshll.u32 %s2859_s18, 4  ;;  %s2864_s11 = int_to_ptr.hbm [resolvable:$true] %s2863_s11 }
 0x242   : > { %v1204_v40 = vpack.c.bf16 %v1196_v38, %v1196_v38  ;;  %s4120_s27 = sshra.s32 %s2864_s11, 4  ;;  %s4121_s27 = int_to_ptr.hbm [resolvable:$true] %s4120_s27 }
 0x243   : > { %s4122_s16 = scalar_lea.hbm %s4121_s27, 8  ;;  %p4127_p7 = scmp.lt.s32.totalorder %s4121_s27, %s4889_s13 }
 0x244   : > { %v1240_v43 = vunpack.c.l.b16 %v1204_v40  ;;  %p4123_p1 = scmp.ne.s32.totalorder %s4121_s27, %s4122_s16  ;;  %p4128_p8 = scmp.lt.s32.totalorder %s4126_s17, %s4122_s16 }
 0x245   : > { %1410 = vmatpush.bf16.msrb.mxu3 %v3633_v58  ;;  %1819 = vmatpush.bf16.msra.mxu2 %v3658_v6  ;;  %v3668_v58 = vld [vmem:[#allocation8 + $0x58] sm:$0xff] }
 0x246   : > { %v1254_v50 = vsel %vm1253_vm4, %v1240_v43, %v1252_v48  ;;  %v3671_v43 = vld [vmem:[#allocation8 + $0x70] sm:$0xff]  ;;  %p4124_p5 = pnand %p4123_p1, %p4346_p4  ;;  %p4129_p9 = por %p4128_p8, %p4127_p7 }
 0x247   : > { %v1255_v21 = vpack.c.b16 %v1254_v50, %v1254_v50  ;;  %v3670_v50 = vld [vmem:[#allocation8 + $0x68] sm:$0xff] }
 0x248   : > { %p4125_p12 = pneg %p4124_p5 }
 0x249   : > { %1313 = vmatmul.bf16.vlgmr.msrb.gmra.mxu2 %v1255_v21  ;;  %v1732_v28 = vpop.f32.mrf.mxu1  ;;  %v4777_v21 = vld [vmem:[%s4883_s7 + $0x1] ss:$0 sm:$0xff] }
 0x24a   : > { %1820 = vmatpush.bf16.msra.mxu2 %v3657_v8  ;;  %v1730_v51 = vadd.f32 %v4777_v21, %v1729_v37  ;;  %v1733_v52 = vadd.f32 %v4777_v21, %v1732_v28  ;;  %v1728_v26 = vadd.f32 %v4777_v21, %v1727_v36  ;;  %v3680_v8 = vld [vmem:[#allocation10 + $0x78] sm:$0xff]  ;;  %p4130_p10 = pnand %p4129_p9, %p4125_p12 }
 0x24e   : > { %2018 = vmatpush.bf16.msrb.mxu2 %v3672_v42 }
 0x251   : > { %v1734_v40 = vpop.f32.mrf.mxu1 }
 0x252   : > { %2019 = vmatpush.bf16.msrb.mxu2 %v3671_v43  ;;  %v1735_v56 = vadd.f32 %v4777_v21, %v1734_v40  ;;  %v3678_v40 = vld [vmem:[#allocation10 + $0x68] sm:$0xff] }
 0x256   : > { %2020 = vmatpush.bf16.msrb.mxu2 %v3670_v50 }
 0x259   : > { %v1737_v46 = vpop.f32.mrf.mxu1 }
 0x25a   : > { %2021 = vmatpush.bf16.msrb.mxu2 %v3669_v22 }
 0x25e   : > { %2022 = vmatpush.bf16.msrb.mxu2 %v3668_v58 }
 0x261   : > { %v1739_v53 = vpop.f32.mrf.mxu1 }
 0x262   : > { %v1740_v4 = vadd.f32 %v4777_v21, %v1739_v53 }
 0x2cc   : > { %v1314_v60 = vpop.f32.mrf.mxu2 }
 0x2cd   : > { %v1315_v61 = vadd.f32 %v3821_v30, %v1314_v60  ;;  %v1738_v60 = vadd.f32 %v4777_v21, %v1737_v46 }
 0x2cf   : > { %v1319_v45 = vand.u32 2147483647, %v1315_v61  ;;  %v1318_v3 = vmax.f32 %v1315_v61, 0.0 }
 0x2d1   : > { %v1320_v54 = vsub.f32 0.0, %v1319_v45 }
 0x2d3   : > { %v1321_v44 = vmul.f32 1.442695, %v1320_v54 }
 0x2d4   : > { %v1316_v2 = vpop.f32.mrf.mxu2 }
 0x2d5   : > { %3939 = vpow2.f32 %v1321_v44  ;;  %v3667_v44 = vld [vmem:[#allocation8 + $0x50] sm:$0xff] }
 0x2d6   : > { %2023 = vmatpush.bf16.msrb.mxu2 %v3667_v44 }
 0x2db   : > { %v3940_v7 = vpop.eup %3939 }
 0x2dc   : > { %v1323_v35 = vadd.f32 1.0, %v3940_v7  ;;  %v1326_v18 = vmul.f32 -0.5, %v3940_v7  ;;  %v1329_v1 = vand.u32 2147483647, %v3940_v7 }
 0x2de   : > { %3941 = vlog2.f32 %v1323_v35  ;;  %v1327_v49 = vadd.f32 1.0, %v1326_v18  ;;  %vm1330_vm5 = vcmp.lt.f32.partialorder %v1329_v1, 0.0004427343  ;;  %v1742_v1 = vpop.f32.mrf.mxu1 }
 0x2e0   : > { %v1328_v14 = vmul.f32 %v3940_v7, %v1327_v49  ;;  %v3666_v49 = vld [vmem:[#allocation8 + $0x48] sm:$0xff] }
 0x2e1   : > { %2024 = vmatpush.bf16.msrb.mxu2 %v3666_v49 }
 0x2e4   : > { %v3942_v12 = vpop.eup %3941 }
 0x2e5   : > { %v1325_v13 = vmul.f32 0.6931472, %v3942_v12 }
 0x2e6   : > { %v1744_v28 = vpop.f32.mrf.mxu1 }
 0x2e7   : > { %v1331_v15 = vsel %vm1330_vm5, %v1328_v14, %v1325_v13 }
 0x2e8   : > { %v1332_v16 = vadd.f32 %v1331_v15, %v1318_v3  ;;  %v3665_v15 = vld [vmem:[#allocation8 + $0x40] sm:$0xff] }
 0x2e9   : > { %2025 = vmatpush.bf16.msrb.mxu2 %v3665_v15 }
 0x2ea   : > { %v3172_v55 = vadd.f32 -0.6931472, %v1332_v16 }
 0x2ec   : > { %v1334_v17 = vpack.c.bf16 %v3172_v55, %v3172_v55 }
 0x2ee   : > { %1411 = vmatmul.bf16.vlgmr.msrb.gmra.mxu3 %v1334_v17 }
 0x371   : > { %v1412_v20 = vpop.f32.mrf.mxu3 }
 0x372   : > { %v1413_v23 = vadd.f32 %v3822_v57, %v1412_v20  ;;  %v1743_v57 = vadd.f32 %v4777_v21, %v1742_v1 }
 0x374   : > { %v4749_v47 = vadd.f32 %v3951_v24, %v1413_v23 }
 0x376   : > { %v1747_v25 = vpack.c.bf16 %v4749_v47, %v4749_v47 }
 0x378   : > { %1821 = vmatmul.bf16.vlgmr.msra.gmra.mxu2 %v1747_v25 }
 0x379   : > { %v1414_v27 = vpop.f32.mrf.mxu3 }
 0x37a   : > { %v3679_v27 = vld [vmem:[#allocation10 + $0x70] sm:$0xff] }
 0x3fb   : > { %v1822_v11 = vpop.f32.mrf.mxu2 }
 0x3fc   : > { %v1826_v29 = vpack.c.bf16 %v1822_v11, %v1822_v11 }
 0x3fe   : > { %v1828_v9 = vsel %vm1108_vm0, %v1826_v29, 0 }
 0x3ff   : > { %1837 = vmatpush.bf16.msra.mxu3 %v1828_v9 }
 0x402   : > { %3327 = vmatmul.msk.bf16.vlgmr.msra.gmra.mxu3 %vm1095_vm1, %v4755_v32 }
 0x403   : > { %v1824_v33 = vpop.f32.mrf.mxu2  ;;  %2118 = vmatpush.bf16.msrb.mxu3 %v3680_v8 }
 0x407   : > { %2119 = vmatpush.bf16.msrb.mxu3 %v3679_v27 }
 0x40b   : > { %2120 = vmatpush.bf16.msrb.mxu3 %v3678_v40 }
 0x412   : > { %3328 = vmatmul.msk.bf16.gmra.mxu3 %vm1095_vm1, %v4760_v59 }
 0x422   : > { %3329 = vmatmul.msk.bf16.gmra.mxu3 %vm1095_vm1, %v4765_v41 }
 0x432   : > { %3330 = vmatmul.msk.bf16.gmra.mxu3 %vm1095_vm1, %v4770_v34 }
 0x485   : > { %v1839_v38 = vpop.f32.mrf.mxu3 }
 0x486   : > { %v1859_v62 = vmul.f32 %v1839_v38, %v1728_v26 }
 0x488   : > { %v1867_v5 = vrot.slane %v1859_v62, 4 }
 0x48a   : > { %v1868_v13 = vadd.f32 %v1867_v5, %v1859_v62 }
 0x48c   : > { %v1869_v20 = vrot.slane %v1868_v13, 2 }
 0x48d   : > { %v1841_v39 = vpop.f32.mrf.mxu3 }
 0x48e   : > { %v1860_v30 = vmul.f32 %v1841_v39, %v1730_v51  ;;  %v1870_v36 = vadd.f32 %v1869_v20, %v1868_v13 }
 0x490   : > { %v1873_v54 = vrot.slane %v1860_v30, 4  ;;  %v1871_v50 = vrot.slane %v1870_v36, 1 }
 0x492   : > { %v1874_v18 = vadd.f32 %v1873_v54, %v1860_v30 }
 0x494   : > { %v1875_v55 = vrot.slane %v1874_v18, 2 }
 0x495   : > { %v1844_v31 = vpop.f32.mrf.mxu3 }
 0x496   : > { %v1861_v61 = vmul.f32 %v1844_v31, %v1733_v52  ;;  %v1876_v11 = vadd.f32 %v1875_v55, %v1874_v18 }
 0x498   : > { %v1879_v2 = vrot.slane %v1861_v61, 4  ;;  %v1877_v31 = vrot.slane %v1876_v11, 1 }
 0x49a   : > { %v1880_v12 = vadd.f32 %v1879_v2, %v1861_v61 }
 0x49c   : > { %v1881_v6 = vrot.slane %v1880_v12, 2 }
 0x49d   : > { %v1846_v48 = vpop.f32.mrf.mxu3 }
 0x49e   : > { %v1862_v45 = vmul.f32 %v1846_v48, %v1735_v56  ;;  %v1882_v33 = vadd.f32 %v1881_v6, %v1880_v12  ;;  %v1745_v48 = vadd.f32 %v4777_v21, %v1744_v28 }
 0x4a0   : > { %v1885_v7 = vrot.slane %v1862_v45, 4  ;;  %v1883_v46 = vrot.slane %v1882_v33, 1 }
 0x4a2   : > { %v1886_v14 = vadd.f32 %v1885_v7, %v1862_v45  ;;  %v1884_v58 = vadd.f32 %v1883_v46, %v1882_v33  ;;  %v3676_v33 = vld [vmem:[#allocation10 + $0x58] sm:$0xff] }
 0x4a4   : > { %v1887_v23 = vrot.slane %v1886_v14, 2  ;;  %v1917_v21 = vpack.c.bf16 %v1884_v58, %v1884_v58 }
 0x4a5   : > { %v1849_v19 = vpop.f32.mrf.mxu3 }
 0x4a6   : > { %v1863_v0 = vmul.f32 %v1849_v19, %v1738_v60  ;;  %v1888_v37 = vadd.f32 %v1887_v23, %v1886_v14  ;;  %v1878_v19 = vadd.f32 %v1877_v31, %v1876_v11  ;;  %v1872_v60 = vadd.f32 %v1871_v50, %v1870_v36  ;;  %v3675_v36 = vld [vmem:[#allocation10 + $0x50] sm:$0xff]  ;;  %v3704_v31 = vld [vmem:[#allocation7 + $0xb8] sm:$0xff] }
 0x4a7   : > { %v1955_v1 = vunpack.c.l.b16 %v1917_v21  ;;  %2528 = vmatpush.bf16.msra.mxu2 %v3704_v31  ;;  %v3698_v21 = vld [vmem:[#allocation7 + $0x88] sm:$0xff] }
 0x4a8   : > { %v1891_v35 = vrot.slane %v1863_v0, 4  ;;  %v1889_v22 = vrot.slane %v1888_v37, 1  ;;  %v1916_v54 = vpack.c.bf16 %v1878_v19, %v1878_v19  ;;  %v1915_v5 = vpack.c.bf16 %v1872_v60, %v1872_v60  ;;  %v3700_v19 = vld [vmem:[#allocation7 + $0x98] sm:$0xff] }
 0x4aa   : > { %v1892_v16 = vadd.f32 %v1891_v35, %v1863_v0  ;;  %v1890_v61 = vadd.f32 %v1889_v22, %v1888_v37  ;;  %v1954_v18 = vunpack.c.l.b16 %v1916_v54  ;;  %v1953_v13 = vunpack.c.l.b16 %v1915_v5  ;;  %v3823_v37 = vld [vmem:[%s4886_s10 + $0x1] ss:$0 sm:$0xff]  ;;  %v3702_v22 = vld [vmem:[#allocation7 + $0xa8] sm:$0xff] }
 0x4ab   : > { %v3824_v5 = vld [vmem:[%s4888_s12 + $0x1] ss:$0 sm:$0xff] }
 0x4ac   : > { %v1893_v24 = vrot.slane %v1892_v16, 2  ;;  %v1918_v7 = vpack.c.bf16 %v1890_v61, %v1890_v61 }
 0x4ad   : > { %v1851_v10 = vpop.f32.mrf.mxu3 }
 0x4ae   : > { %v1864_v63 = vmul.f32 %v1851_v10, %v1740_v4  ;;  %v1894_v39 = vadd.f32 %v1893_v24, %v1892_v16  ;;  %v1956_v14 = vunpack.c.l.b16 %v1918_v7  ;;  %v1961_v16 = vsel %vm1241_vm12, %v1954_v18, %v1953_v13 }
 0x4af   : > { %v1962_v6 = vsel %vm1243_vm13, %v1955_v1, %v1961_v16 }
 0x4b0   : > { %v1897_v3 = vrot.slane %v1864_v63, 4  ;;  %v1895_v52 = vrot.slane %v1894_v39, 1 }
 0x4b2   : > { %v1898_v17 = vadd.f32 %v1897_v3, %v1864_v63  ;;  %v1896_v0 = vadd.f32 %v1895_v52, %v1894_v39  ;;  %v3673_v39 = vld [vmem:[#allocation10 + $0x40] sm:$0xff] }
 0x4b4   : > { %v1899_v29 = vrot.slane %v1898_v17, 2  ;;  %v1919_v10 = vpack.c.bf16 %v1896_v0, %v1896_v0 }
 0x4b5   : > { %v1854_v25 = vpop.f32.mrf.mxu3 }
 0x4b6   : > { %v1865_v9 = vmul.f32 %v1854_v25, %v1743_v57  ;;  %v1900_v42 = vadd.f32 %v1899_v29, %v1898_v17  ;;  %v1957_v15 = vunpack.c.l.b16 %v1919_v10  ;;  %v1963_v57 = vsel %vm1245_vm14, %v1956_v14, %v1962_v6  ;;  %v3712_v6 = vld [vmem:[#allocation8 + $0xb8] sm:$0xff] }
 0x4b8   : > { %v1903_v38 = vrot.slane %v1865_v9, 4  ;;  %v1901_v26 = vrot.slane %v1900_v42, 1  ;;  %v1964_v23 = vsel %vm1247_vm15, %v1957_v15, %v1963_v57 }
 0x4ba   : > { %v1904_v43 = vadd.f32 %v1903_v38, %v1865_v9  ;;  %v1902_v44 = vadd.f32 %v1901_v26, %v1900_v42  ;;  %v3677_v9 = vld [vmem:[#allocation10 + $0x60] sm:$0xff]  ;;  %v3674_v38 = vld [vmem:[#allocation10 + $0x48] sm:$0xff] }
 0x4bb   : > { %2121 = vmatpush.bf16.msrb.mxu3 %v3677_v9  ;;  %v3708_v9 = vld [vmem:[#allocation8 + $0x98] sm:$0xff] }
 0x4bc   : > { %v1905_v51 = vrot.slane %v1904_v43, 2  ;;  %v1920_v63 = vpack.c.bf16 %v1902_v44, %v1902_v44 }
 0x4bd   : > { %v1856_v53 = vpop.f32.mrf.mxu3 }
 0x4be   : > { %v1906_v56 = vadd.f32 %v1905_v51, %v1904_v43  ;;  %v1866_v30 = vmul.f32 %v1856_v53, %v1745_v48  ;;  %v1958_v55 = vunpack.c.l.b16 %v1920_v63  ;;  %v3703_v43 = vld [vmem:[#allocation7 + $0xb0] sm:$0xff]  ;;  %v3701_v51 = vld [vmem:[#allocation7 + $0xa0] sm:$0xff] }
 0x4bf   : > { %2122 = vmatpush.bf16.msrb.mxu3 %v3676_v33  ;;  %2529 = vmatpush.bf16.msra.mxu2 %v3703_v43 }
 0x4c0   : > { %v1907_v62 = vrot.slane %v1906_v56, 1  ;;  %v1909_v45 = vrot.slane %v1866_v30, 4  ;;  %v1965_v24 = vsel %vm1249_vm2, %v1958_v55, %v1964_v23 }
 0x4c2   : > { %v1910_v2 = vadd.f32 %v1909_v45, %v1866_v30  ;;  %v1908_v4 = vadd.f32 %v1907_v62, %v1906_v56  ;;  %v3699_v56 = vld [vmem:[#allocation7 + $0x90] sm:$0xff] }
 0x4c3   : > { %2123 = vmatpush.bf16.msrb.mxu3 %v3675_v36  ;;  %2530 = vmatpush.bf16.msra.mxu2 %v3702_v22 }
 0x4c4   : > { %v1911_v35 = vrot.slane %v1910_v2, 2  ;;  %v1921_v12 = vpack.c.bf16 %v1908_v4, %v1908_v4  ;;  %v3697_v4 = vld [vmem:[#allocation7 + $0x80] sm:$0xff] }
 0x4c6   : > { %v1912_v49 = vadd.f32 %v1911_v35, %v1910_v2  ;;  %v1959_v8 = vunpack.c.l.b16 %v1921_v12 }
 0x4c7   : > { %2124 = vmatpush.bf16.msrb.mxu3 %v3674_v38  ;;  %2531 = vmatpush.bf16.msra.mxu2 %v3701_v51 }
 0x4c8   : > { %v1913_v3 = vrot.slane %v1912_v49, 1  ;;  %v1966_v27 = vsel %vm1251_vm3, %v1959_v8, %v1965_v24 }
 0x4ca   : > { %v1914_v17 = vadd.f32 %v1913_v3, %v1912_v49 }
 0x4cb   : > { %2125 = vmatpush.bf16.msrb.mxu3 %v3673_v39  ;;  %2532 = vmatpush.bf16.msra.mxu2 %v3700_v19 }
 0x4cc   : > { %v1922_v20 = vpack.c.bf16 %v1914_v17, %v1914_v17 }
 0x4ce   : > { %v1960_v25 = vunpack.c.l.b16 %v1922_v20 }
 0x4cf   : > { %2533 = vmatpush.bf16.msra.mxu2 %v3699_v56 }
 0x4d0   : > { %v1967_v11 = vsel %vm1253_vm4, %v1960_v25, %v1966_v27 }
 0x4d1   : > { %v1968_v29 = vpack.c.b16 %v1967_v11, %v1967_v11 }
 0x4d3   : > { %2026 = vmatmul.bf16.vlgmr.msrb.gmra.mxu2 %v1968_v29 }
 0x4d4   : > { %2534 = vmatpush.bf16.msra.mxu2 %v3698_v21 }
 0x4d8   : > { %2535 = vmatpush.bf16.msra.mxu2 %v3697_v4 }
 0x4dc   : > { %2733 = vmatpush.bf16.msrb.mxu2 %v3712_v6 }
 0x556   : > { %v2027_v28 = vpop.f32.mrf.mxu2 }
 0x557   : > { %v2028_v40 = vadd.f32 %v3823_v37, %v2027_v28 }
 0x559   : > { %v2032_v42 = vand.u32 2147483647, %v2028_v40  ;;  %v2031_v45 = vmax.f32 %v2028_v40, 0.0  ;;  %v3707_v40 = vld [vmem:[#allocation8 + $0x90] sm:$0xff] }
 0x55b   : > { %v2033_v46 = vsub.f32 0.0, %v2032_v42 }
 0x55d   : > { %v2034_v48 = vmul.f32 1.442695, %v2033_v46 }
 0x55e   : > { %v2029_v50 = vpop.f32.mrf.mxu2 }
 0x55f   : > { %3943 = vpow2.f32 %v2034_v48 }
 0x565   : > { %v3944_v52 = vpop.eup %3943 }
 0x566   : > { %v2036_v53 = vadd.f32 1.0, %v3944_v52  ;;  %v2039_v26 = vmul.f32 -0.5, %v3944_v52  ;;  %v2042_v58 = vand.u32 2147483647, %v3944_v52 }
 0x568   : > { %3945 = vlog2.f32 %v2036_v53  ;;  %v2040_v30 = vadd.f32 1.0, %v2039_v26  ;;  %vm2043_vm6 = vcmp.lt.f32.partialorder %v2042_v58, 0.0004427343  ;;  %v3705_v58 = vld [vmem:[#allocation8 + $0x80] sm:$0xff] }
 0x56a   : > { %v2041_v62 = vmul.f32 %v3944_v52, %v2040_v30  ;;  %v3706_v52 = vld [vmem:[#allocation8 + $0x88] sm:$0xff] }
 0x56e   : > { %v3946_v60 = vpop.eup %3945 }
 0x56f   : > { %v2038_v61 = vmul.f32 0.6931472, %v3946_v60 }
 0x571   : > { %v2044_v0 = vsel %vm2043_vm6, %v2041_v62, %v2038_v61 }
 0x572   : > { %v2045_v54 = vadd.f32 %v2044_v0, %v2031_v45  ;;  %v3720_v0 = vld [vmem:[#allocation10 + $0xb8] sm:$0xff] }
 0x573   : > { %2833 = vmatpush.bf16.msrb.mxu0 %v3720_v0 }
 0x574   : > { %v3364_v44 = vadd.f32 -0.6931472, %v2045_v54 }
 0x576   : > { %v2047_v2 = vpack.c.bf16 %v3364_v44, %v3364_v44 }
 0x578   : > { %2126 = vmatmul.bf16.vlgmr.msrb.gmra.mxu3 %v2047_v2 }
 0x5fb   : > { %v2127_v7 = vpop.f32.mrf.mxu3 }
 0x5fc   : > { %v2128_v35 = vadd.f32 %v3824_v5, %v2127_v7  ;;  %v3719_v5 = vld [vmem:[#allocation10 + $0xb0] sm:$0xff] }
 0x5fd   : > { %2834 = vmatpush.bf16.msrb.mxu0 %v3719_v5  ;;  %v3716_v5 = vld [vmem:[#allocation10 + $0x98] sm:$0xff] }
 0x5fe   : > { %v4801_v10 = vadd.f32 %v2128_v35, %v4749_v47  ;;  %v2442_v47 = vpop.f32.mrf.mxu1 }
 0x600   : > { %v2462_v18 = vpack.c.bf16 %v4801_v10, %v4801_v10 }
 0x602   : > { %2536 = vmatmul.bf16.vlgmr.msra.gmra.mxu2 %v2462_v18 }
 0x603   : > { %v2129_v63 = vpop.f32.mrf.mxu3 }
 0x606   : > { %v2444_v14 = vpop.f32.mrf.mxu1 }
 0x60e   : > { %v2447_v15 = vpop.f32.mrf.mxu1 }
 0x616   : > { %v2449_v55 = vpop.f32.mrf.mxu1 }
 0x61e   : > { %v2452_v8 = vpop.f32.mrf.mxu1 }
 0x626   : > { %v2454_v24 = vpop.f32.mrf.mxu1 }
 0x62e   : > { %v2457_v53 = vpop.f32.mrf.mxu1 }
 0x685   : > { %v2537_v49 = vpop.f32.mrf.mxu2 }
 0x686   : > { %v2541_v1 = vpack.c.bf16 %v2537_v49, %v2537_v49 }
 0x688   : > { %v2543_v12 = vsel %vm1108_vm0, %v2541_v1, 0 }
 0x689   : > { %2552 = vmatpush.bf16.msra.mxu3 %v2543_v12 }
 0x68c   : > { %3520 = vmatmul.msk.bf16.vlgmr.msra.gmra.mxu3 %vm1095_vm1, %v4755_v32  ;;  %v3711_v32 = vld [vmem:[#allocation8 + $0xb0] sm:$0xff] }
 0x68d   : > { %v2539_v13 = vpop.f32.mrf.mxu2  ;;  %2734 = vmatpush.bf16.msrb.mxu2 %v3711_v32 }
 0x68e   : > { %v2459_v13 = vpop.f32.mrf.mxu1 }
 0x69c   : > { %3521 = vmatmul.msk.bf16.gmra.mxu3 %vm1095_vm1, %v4760_v59  ;;  %v3710_v59 = vld [vmem:[#allocation8 + $0xa8] sm:$0xff] }
 0x69d   : > { %2735 = vmatpush.bf16.msrb.mxu2 %v3710_v59 }
 0x6ac   : > { %3522 = vmatmul.msk.bf16.gmra.mxu3 %vm1095_vm1, %v4765_v41  ;;  %v4817_v41 = vld [vmem:[%s4883_s7 + $0x2] ss:$0 sm:$0xff] }
 0x6ad   : > { %v2445_v20 = vadd.f32 %v4817_v41, %v2444_v14  ;;  %v2448_v23 = vadd.f32 %v4817_v41, %v2447_v15  ;;  %v2443_v27 = vadd.f32 %v4817_v41, %v2442_v47  ;;  %v2450_v11 = vadd.f32 %v4817_v41, %v2449_v55  ;;  %v3718_v14 = vld [vmem:[#allocation10 + $0xa8] sm:$0xff] }
 0x6ae   : > { %v2453_v33 = vadd.f32 %v4817_v41, %v2452_v8  ;;  %v2455_v42 = vadd.f32 %v4817_v41, %v2454_v24  ;;  %v2458_v54 = vadd.f32 %v4817_v41, %v2457_v53  ;;  %2835 = vmatpush.bf16.msrb.mxu0 %v3718_v14 }
 0x6bc   : > { %3523 = vmatmul.msk.bf16.gmra.mxu3 %vm1095_vm1, %v4770_v34  ;;  %v3709_v34 = vld [vmem:[#allocation8 + $0xa0] sm:$0xff] }
 0x6bd   : > { %2736 = vmatpush.bf16.msrb.mxu2 %v3709_v34 }
 0x6c1   : > { %2737 = vmatpush.bf16.msrb.mxu2 %v3708_v9 }
 0x6c5   : > { %2738 = vmatpush.bf16.msrb.mxu2 %v3707_v40 }
 0x6c9   : > { %2739 = vmatpush.bf16.msrb.mxu2 %v3706_v52 }
 0x6cd   : > { %2740 = vmatpush.bf16.msrb.mxu2 %v3705_v58 }
 0x70f   : > { %v2554_v3 = vpop.f32.mrf.mxu3 }
 0x710   : > { %v2574_v37 = vmul.f32 %v2554_v3, %v2443_v27 }
 0x712   : > { %v2582_v43 = vrot.slane %v2574_v37, 4 }
 0x714   : > { %v2583_v26 = vadd.f32 %v2582_v43, %v2574_v37 }
 0x716   : > { %v2584_v44 = vrot.slane %v2583_v26, 2 }
 0x717   : > { %v2556_v16 = vpop.f32.mrf.mxu3 }
 0x718   : > { %v2575_v29 = vmul.f32 %v2556_v16, %v2445_v20  ;;  %v2585_v49 = vadd.f32 %v2584_v44, %v2583_v26 }
 0x71a   : > { %v2588_v39 = vrot.slane %v2575_v29, 4  ;;  %v2586_v6 = vrot.slane %v2585_v49, 1 }
 0x71c   : > { %v2589_v22 = vadd.f32 %v2588_v39, %v2575_v29  ;;  %v2587_v27 = vadd.f32 %v2586_v6, %v2585_v49  ;;  %v3713_v49 = vld [vmem:[#allocation10 + $0x80] sm:$0xff] }
 0x71e   : > { %v2590_v61 = vrot.slane %v2589_v22, 2  ;;  %v2630_v39 = vpack.c.bf16 %v2587_v27, %v2587_v27 }
 0x71f   : > { %v2559_v17 = vpop.f32.mrf.mxu3 }
 0x720   : > { %v2576_v36 = vmul.f32 %v2559_v17, %v2448_v23  ;;  %v2591_v7 = vadd.f32 %v2590_v61, %v2589_v22  ;;  %v2460_v17 = vadd.f32 %v4817_v41, %v2459_v13 }
 0x722   : > { %v2594_v31 = vrot.slane %v2576_v36, 4  ;;  %v2592_v3 = vrot.slane %v2591_v7, 1 }
 0x724   : > { %v2595_v19 = vadd.f32 %v2594_v31, %v2576_v36  ;;  %v2593_v34 = vadd.f32 %v2592_v3, %v2591_v7  ;;  %v3715_v7 = vld [vmem:[#allocation10 + $0x90] sm:$0xff] }
 0x726   : > { %v2596_v45 = vrot.slane %v2595_v19, 2  ;;  %v2631_v36 = vpack.c.bf16 %v2593_v34, %v2593_v34 }
 0x727   : > { %v2561_v57 = vpop.f32.mrf.mxu3 }
 0x728   : > { %v2577_v38 = vmul.f32 %v2561_v57, %v2450_v11  ;;  %v2597_v63 = vadd.f32 %v2596_v45, %v2595_v19  ;;  %v2669_v43 = vunpack.c.l.b16 %v2631_v36 }
 0x72a   : > { %v2600_v46 = vrot.slane %v2577_v38, 4  ;;  %v2598_v55 = vrot.slane %v2597_v63, 1 }
 0x72c   : > { %v2601_v56 = vadd.f32 %v2600_v46, %v2577_v38 }
 0x72e   : > { %v2602_v2 = vrot.slane %v2601_v56, 2 }
 0x72f   : > { %v2564_v25 = vpop.f32.mrf.mxu3 }
 0x730   : > { %v2578_v28 = vmul.f32 %v2564_v25, %v2453_v33  ;;  %v2603_v1 = vadd.f32 %v2602_v2, %v2601_v56  ;;  %v2599_v25 = vadd.f32 %v2598_v55, %v2597_v63 }
 0x732   : > { %v2606_v48 = vrot.slane %v2578_v28, 4  ;;  %v2604_v32 = vrot.slane %v2603_v1, 1  ;;  %v2632_v41 = vpack.c.bf16 %v2599_v25, %v2599_v25 }
 0x734   : > { %v2607_v60 = vadd.f32 %v2606_v48, %v2578_v28  ;;  %v2605_v11 = vadd.f32 %v2604_v32, %v2603_v1 }
 0x736   : > { %v2608_v21 = vrot.slane %v2607_v60, 2  ;;  %v2633_v40 = vpack.c.bf16 %v2605_v11, %v2605_v11 }
 0x737   : > { %v2566_v50 = vpop.f32.mrf.mxu3 }
 0x738   : > { %v2579_v51 = vmul.f32 %v2566_v50, %v2455_v42  ;;  %v2609_v47 = vadd.f32 %v2608_v21, %v2607_v60  ;;  %v2670_v50 = vunpack.c.l.b16 %v2632_v41  ;;  %v2671_v52 = vunpack.c.l.b16 %v2633_v40 }
 0x73a   : > { %v2612_v30 = vrot.slane %v2579_v51, 4  ;;  %v2610_v57 = vrot.slane %v2609_v47, 1 }
 0x73c   : > { %v2613_v62 = vadd.f32 %v2612_v30, %v2579_v51  ;;  %v2611_v33 = vadd.f32 %v2610_v57, %v2609_v47  ;;  %v2668_v51 = vunpack.c.l.b16 %v2630_v39 }
 0x73e   : > { %v2614_v35 = vrot.slane %v2613_v62, 2  ;;  %v2634_v42 = vpack.c.bf16 %v2611_v33, %v2611_v33  ;;  %v2676_v26 = vsel %vm1241_vm12, %v2669_v43, %v2668_v51 }
 0x73f   : > { %v2569_v4 = vpop.f32.mrf.mxu3  ;;  %v2677_v58 = vsel %vm1243_vm13, %v2670_v50, %v2676_v26 }
 0x740   : > { %v2580_v18 = vmul.f32 %v2569_v4, %v2458_v54  ;;  %v2615_v15 = vadd.f32 %v2614_v35, %v2613_v62  ;;  %v2672_v19 = vunpack.c.l.b16 %v2634_v42  ;;  %v2678_v61 = vsel %vm1245_vm14, %v2671_v52, %v2677_v58  ;;  %v3717_v4 = vld [vmem:[#allocation10 + $0xa0] sm:$0xff]  ;;  %v3825_v35 = vld [vmem:[%s4886_s10 + $0x2] ss:$0 sm:$0xff] }
 0x741   : > { %2836 = vmatpush.bf16.msrb.mxu0 %v3717_v4 }
 0x742   : > { %v2618_v12 = vrot.slane %v2580_v18, 4  ;;  %v2616_v20 = vrot.slane %v2615_v15, 1  ;;  %v2679_v45 = vsel %vm1247_vm15, %v2672_v19, %v2678_v61 }
 0x744   : > { %v2619_v16 = vadd.f32 %v2618_v12, %v2580_v18  ;;  %v2617_v37 = vadd.f32 %v2616_v20, %v2615_v15  ;;  %v3714_v18 = vld [vmem:[#allocation10 + $0x88] sm:$0xff] }
 0x745   : > { %2837 = vmatpush.bf16.msrb.mxu0 %v3716_v5 }
 0x746   : > { %v2620_v8 = vrot.slane %v2619_v16, 2  ;;  %v2635_v46 = vpack.c.bf16 %v2617_v37, %v2617_v37 }
 0x747   : > { %v2571_v59 = vpop.f32.mrf.mxu3 }
 0x748   : > { %v2621_v23 = vadd.f32 %v2620_v8, %v2619_v16  ;;  %v2581_v24 = vmul.f32 %v2571_v59, %v2460_v17  ;;  %v2673_v56 = vunpack.c.l.b16 %v2635_v46 }
 0x749   : > { %2838 = vmatpush.bf16.msrb.mxu0 %v3715_v7 }
 0x74a   : > { %v2622_v29 = vrot.slane %v2621_v23, 1  ;;  %v2624_v9 = vrot.slane %v2581_v24, 4  ;;  %v2680_v0 = vsel %vm1249_vm2, %v2673_v56, %v2679_v45 }
 0x74c   : > { %v2625_v38 = vadd.f32 %v2624_v9, %v2581_v24  ;;  %v2623_v28 = vadd.f32 %v2622_v29, %v2621_v23  ;;  %v3826_v24 = vld [vmem:[%s4888_s12 + $0x2] ss:$0 sm:$0xff] }
 0x74d   : > { %2839 = vmatpush.bf16.msrb.mxu0 %v3714_v18 }
 0x74e   : > { %v2626_v31 = vrot.slane %v2625_v38, 2  ;;  %v2636_v22 = vpack.c.bf16 %v2623_v28, %v2623_v28 }
 0x750   : > { %v2627_v48 = vadd.f32 %v2626_v31, %v2625_v38  ;;  %v2674_v60 = vunpack.c.l.b16 %v2636_v22 }
 0x751   : > { %2840 = vmatpush.bf16.msrb.mxu0 %v3713_v49 }
 0x752   : > { %v2628_v53 = vrot.slane %v2627_v48, 1  ;;  %v2681_v44 = vsel %vm1251_vm3, %v2674_v60, %v2680_v0 }
 0x754   : > { %v2629_v30 = vadd.f32 %v2628_v53, %v2627_v48 }
 0x756   : > { %v2637_v62 = vpack.c.bf16 %v2629_v30, %v2629_v30 }
 0x758   : > { %v2675_v54 = vunpack.c.l.b16 %v2637_v62 }
 0x75a   : > { %v2682_v2 = vsel %vm1253_vm4, %v2675_v54, %v2681_v44 }
 0x75b   : > { %v2683_v21 = vpack.c.b16 %v2682_v2, %v2682_v2 }
 0x75d   : > { %2741 = vmatmul.bf16.vlgmr.msrb.gmra.mxu2 %v2683_v21 }
 0x7e0   : > { %v2742_v63 = vpop.f32.mrf.mxu2 }
 0x7e1   : > { %v2743_v1 = vadd.f32 %v3825_v35, %v2742_v63 }
 0x7e3   : > { %v2747_v12 = vand.u32 2147483647, %v2743_v1  ;;  %v2746_v57 = vmax.f32 %v2743_v1, 0.0 }
 0x7e5   : > { %v2748_v13 = vsub.f32 0.0, %v2747_v12 }
 0x7e7   : > { %v2749_v47 = vmul.f32 1.442695, %v2748_v13 }
 0x7e8   : > { %v2744_v14 = vpop.f32.mrf.mxu2 }
 0x7e9   : > { %3947 = vpow2.f32 %v2749_v47 }
 0x7ef   : > { %v3948_v3 = vpop.eup %3947 }
 0x7f0   : > { %v2751_v15 = vadd.f32 1.0, %v3948_v3  ;;  %v2754_v16 = vmul.f32 -0.5, %v3948_v3  ;;  %v2757_v17 = vand.u32 2147483647, %v3948_v3 }
 0x7f2   : > { %3949 = vlog2.f32 %v2751_v15  ;;  %v2755_v55 = vadd.f32 1.0, %v2754_v16  ;;  %vm2758_vm0 = vcmp.lt.f32.partialorder %v2757_v17, 0.0004427343 }
 0x7f4   : > { %v2756_v8 = vmul.f32 %v3948_v3, %v2755_v55 }
 0x7f8   : > { %v3950_v6 = vpop.eup %3949 }
 0x7f9   : > { %v2753_v32 = vmul.f32 0.6931472, %v3950_v6 }
 0x7fb   : > { %v2759_v59 = vsel %vm2758_vm0, %v2756_v8, %v2753_v32 }
 0x7fc   : > { %v2760_v34 = vadd.f32 %v2759_v59, %v2746_v57 }
 0x7fe   : > { %v3557_v20 = vadd.f32 -0.6931472, %v2760_v34 }
 0x800   : > { %v2762_v23 = vpack.c.bf16 %v3557_v20, %v3557_v20 }
 0x802   : > { %2841 = vmatmul.bf16.vlgmr.msrb.gmra.mxu0 %v2762_v23 }
 0x87f   : > { %v2842_v25 = vpop.f32.mrf.mxu0 }
 0x880   : > { %v2843_v27 = vadd.f32 %v3826_v24, %v2842_v25 }
 0x882   : > { %v2846_v11 = vadd.f32 %v2843_v27, %v4801_v10 }
 0x884   : > { %2847 = vst [vmem:[%s553_s24] sm:$0xff] %v2846_v11 }
 0x885   : > { %4133 = shalt.err (!%p4130_p10)
}
 0x886   : > { %3739 = dma.vmem_to_hbm [thread:$0]  (%p4346_p4), %s2862_s20, 128, %s2864_s11, %s2849_s15  }
 0x887   : > { %v2844_v10 = vpop.f32.mrf.mxu0 }
 0x888 PF: > { %s2875_s30 = sand.u32 1, %s4168_s25   ;;  %p4932_p13 = scmp.ge.s32.totalorder %s4180_s28, 2 }
 0x889   : > { %s2876_s8 = scalar_lea.sflag [#allocation4], %s2875_s30 }
 0x88a   : > { %p3759_p11 = pnand %p4932_p13, %p4350_p6 }
 0x88c   : > { %p3760_p0 = pneg %p3759_p11 }
 0x88e   : > { %4163 = dma.done.wait (%p3760_p0), %s2876_s8, 128  }
 0x88f   : > { %4165 = vsyncadd (%p3760_p0), %s2876_s8, 4294967168  ;;  %s4933_s28 = sld [smem:[#allocation17_spill]]  ;;  %s4936_s25 = smov %s4172_s26 }
 0x890   : > { %s4934_s14 = sld [smem:[#allocation16_spill]] }
 0x891   : > { %s4935_s27 = sld [smem:[#allocation18_spill]] }
 0x895   : > { %p28_p2 = scmp.ge.s32.totalorder %s4933_s28, 4  }
 0x896   : > { %s4937_s26 = smov %s4934_s14 }
 0x897   :  { %30 = sbr.rel (!%p28_p2) target bundleno = 12 (0xc), region = 157 }
 0x89c   :  { %2882 = vsyncpa [#allocation3], 1 }
 0x89d   :  { %2884 = vsyncpa [#allocation3 + $0x1], 1 }
 0x89e   :  { %2885 = vsyncpa [#allocation6], 1 }
 0x89f   :  { %2886 = vsyncpa [#allocation9], 1 }
 0x8a0   :  { %2887 = vsyncpa [#allocation4], 1 }
 0x8a1   :  { %2889 = vsyncpa [#allocation4 + $0x1], 1 }

</bundles_post_ra>
